<compile_context>
chip_gen: v5e
topology: v5e:2x2
jax: 0.10.0
libtpu: 0.0.40
codegen_flags: <defaults>
</compile_context>

<pallas_src>
import functools

import jax
import jax.numpy as jnp
from jax import lax
from jax.experimental import pallas as pl
from jax.experimental.pallas import tpu as pltpu


def _dwsc_kernel(x_ref, wdw_ref, wpw_ref, alpha_ref, masks_ref, out_ref, *,
                 block_n, sub_n, C, H, W, K, padding, OUT_CH, eps):
    """One grid step = `block_n` samples.

    x_ref    : (C, block_n, L)        VMEM  channel-major, vertically padded,
                                            lane-flattened input
    wdw_ref  : (C*K*K,)               SMEM  depthwise w, index c*K*K + kh*K + kw
    wpw_ref  : (OUT_CH*C,)            SMEM  pointwise w, index o*C + c
    alpha_ref: (1,)                   SMEM  shared PReLU slope
    masks_ref: (K, H*W)               VMEM  per-kw column-validity masks
    out_ref  : (OUT_CH, block_n, H*W) VMEM  lane-dense output
    """
    HW = H * W
    KK = K * K
    inv_hw = 1.0 / float(HW)
    alpha = alpha_ref[0]
    num_sub = block_n // sub_n

    # Hoist the (1, HW) column masks out of all loops.  Only kw != padding
    # taps can read a wrong-column neighbour in the flat layout.
    mask_rows = [None] * K
    for kw in range(K):
        if kw != padding:
            mask_rows[kw] = masks_ref[pl.ds(kw, 1), :]            # (1, HW)

    def process(base):
        bsl = pl.ds(base, sub_n)

        # ---- depthwise KxK conv + InstanceNorm2d + PReLU, per input channel
        acts = []
        for c in range(C):
            acc = None
            for kw in range(K):                       # group taps by kw: 1 mask mul / group
                part = None
                for kh in range(K):
                    w = wdw_ref[c * KK + kh * K + kw]              # SMEM scalar
                    # 256-lane window -> full-width VPU FMA (vs 16/128 lanes before).
                    win = x_ref[c, bsl, pl.ds(kh * W + kw, HW)]    # (sub_n, HW)
                    t = win * w
                    part = t if part is None else part + t
                if mask_rows[kw] is not None:
                    part = part * mask_rows[kw]        # zero invalid border columns
                acc = part if acc is None else acc + part

            # InstanceNorm2d (affine=False): centered two-pass variance for
            # numerical robustness.  If a bundle dump ever shows XLU binding,
            # fuse the two reduces by reducing a sublane-stacked [a; a^2].
            mean = jnp.sum(acc, axis=-1, keepdims=True) * inv_hw
            cen = acc - mean
            var = jnp.sum(cen * cen, axis=-1, keepdims=True) * inv_hw
            normed = cen * lax.rsqrt(var + eps)

            # PReLU (single shared slope).
            acts.append(jnp.where(normed > 0, normed, alpha * normed))

        # ---- pointwise 1x1 conv on the VPU ---------------------------------
        # (OUT_CH, C) = (8, 4) is far too small for the MXU (>96% idle).  For
        # C/OUT_CH >= ~64/128 switch to jnp.dot on a (sub_n*HW, C) x (C, OUT_CH)
        # reshape with preferred_element_type=f32.
        for o in range(OUT_CH):
            po = acts[0] * wpw_ref[o * C + 0]
            for c in range(1, C):
                po = po + acts[c] * wpw_ref[o * C + c]
            # Dense unmasked (sub_n, HW) store: full lanes, contiguous sublanes.
            out_ref[o, bsl, :] = po

    if num_sub == 1:
        process(0)                                    # fully static indexing
    else:
        # Bound the register working set: only `sub_n` samples of activations
        # are live at once regardless of how large the DMA block is.
        def body(sb, carry):
            process(pl.multiple_of(sb * sub_n, sub_n))
            return carry
        lax.fori_loop(0, num_sub, body, 0, unroll=False)


def _num_tensorcores():
    """TensorCores per device: v7x has 2, v5e/v6e have 1 (feeds block_n pick)."""
    try:
        dev = jax.devices()[0]
        kind = str(getattr(dev, "device_kind", "")).lower()
        if "v7" in kind or "tpu7" in kind:
            return 2
    except Exception:
        pass
    return 1


def _vmem_budget_bytes():
    """Budget so 2x(in block + out block) stays comfortably under the default
    scoped-VMEM limit on every generation (incl. v7x's 64 MiB physical), so no
    vmem_limit_bytes override is required."""
    try:
        phys = int(pltpu.get_tpu_info().vmem_capacity_bytes)
    except Exception:
        phys = 64 << 20        # v7x has the smallest VMEM; be conservative
    return min(max(phys // 4, 4 << 20), 12 << 20)


def _pick_block_n(n, num_cores, max_samples):
    """Largest divisor of n that fits the VMEM budget, subject to:
       - layout legality: block_n % 8 == 0 or block_n == n (sublane tiling)
       - on multi-TC chips (v7x) keep >= num_cores grid steps when possible
       - on 1-TC chips (v5e/v6e) collapse to as few steps as possible."""
    def ok_layout(b):
        return b == n or b % 8 == 0

    divs = [d for d in range(1, n + 1) if n % d == 0]
    cand = [d for d in divs if d <= max_samples and ok_layout(d)]
    if not cand:                                   # pathological batch sizes
        cand = [d for d in divs if ok_layout(d)] or [n]
    if num_cores > 1:
        multi = [d for d in cand if n // d >= num_cores]
        if multi:
            return max(multi)
    return max(cand)


def _pick_sub_n(block_n, cap=8):
    for s in range(min(cap, block_n), 0, -1):
        if block_n % s == 0:
            return s
    return 1


def dwsc_forward(x, w_dw, w_pw, alpha, *, padding, block_n=None,
                 num_cores=None, eps=1e-5):
    """x: (N, C, H, W) f32; w_dw: (C, K, K); w_pw: (OUT_CH, C); alpha: (1,)."""
    N, C, H, W = x.shape
    K = w_dw.shape[-1]
    OUT_CH = w_pw.shape[0]
    assert w_dw.shape == (C, K, K) and w_pw.shape == (OUT_CH, C)
    assert alpha.shape == (1,), "kernel implements nn.PReLU() single shared slope"
    assert 2 * padding == K - 1, "kernel assumes stride-1 'same' depthwise conv"

    HW = H * W
    Hp = H + 2 * padding
    # Flat layout length: `padding` leading zeros + vertically-padded rows +
    # trailing zeros so the largest tap window (start (K-1)*W + K-1) fits.
    L = max(padding + Hp * W, (K - 1) * (W + 1) + HW)

    if num_cores is None:
        num_cores = _num_tensorcores()
    if block_n is None:
        bytes_per_sample = 2 * 4 * (C * L + OUT_CH * HW)   # double-buffered in+out
        max_samples = max(1, _vmem_budget_bytes() // bytes_per_sample)
        block_n = _pick_block_n(N, num_cores, max_samples)
    assert N % block_n == 0 and (block_n % 8 == 0 or block_n == N)
    sub_n = _pick_sub_n(block_n)

    # --- host-side layout prep (one fused pad/transpose; see TODO in header) --
    xv = jnp.pad(x.astype(jnp.float32),
                 ((0, 0), (0, 0), (padding, padding), (0, 0)))       # (N,C,Hp,W)
    xcm = jnp.transpose(xv, (1, 0, 2, 3)).reshape(C, N, Hp * W)      # channel-major
    xlay = jnp.pad(xcm, ((0, 0), (0, 0), (padding, L - padding - Hp * W)))

    # Per-kw column-validity masks (1.0 where output column w is valid).
    col = jnp.arange(HW, dtype=jnp.int32) % W
    masks = jnp.stack(
        [((col + (kw - padding) >= 0) & (col + (kw - padding) < W)).astype(jnp.float32)
         for kw in range(K)], axis=0)                                # (K, HW)

    # Flatten the tiny weights for SMEM scalar reads (1-D avoids 2-D SMEM padding).
    wdw_flat = w_dw.reshape(C * K * K).astype(jnp.float32)
    wpw_flat = w_pw.reshape(OUT_CH * C).astype(jnp.float32)

    kernel = functools.partial(
        _dwsc_kernel, block_n=block_n, sub_n=sub_n, C=C, H=H, W=W, K=K,
        padding=padding, OUT_CH=OUT_CH, eps=eps)

    out_cm = pl.pallas_call(
        kernel,
        out_shape=jax.ShapeDtypeStruct((OUT_CH, N, HW), jnp.float32),
        grid=(N // block_n,),
        in_specs=[
            pl.BlockSpec((C, block_n, L), lambda i: (0, i, 0)),
            pl.BlockSpec(memory_space=pltpu.MemorySpace.SMEM),   # depthwise w
            pl.BlockSpec(memory_space=pltpu.MemorySpace.SMEM),   # pointwise w
            pl.BlockSpec(memory_space=pltpu.MemorySpace.SMEM),   # PReLU alpha
            pl.BlockSpec((K, HW), lambda i: (0, 0)),             # column masks
        ],
        out_specs=pl.BlockSpec((OUT_CH, block_n, HW), lambda i: (0, i, 0)),
        compiler_params=pltpu.CompilerParams(
            dimension_semantics=("parallel",)),
    )(xlay, wdw_flat, wpw_flat, alpha.astype(jnp.float32), masks)

    # Channel-major -> NCHW (cheap layout plumbing in the wrapper).
    return jnp.transpose(out_cm, (1, 0, 2)).reshape(N, OUT_CH, H, W)


def _reference(x, w_dw, w_pw, alpha, *, padding):
    """Pure-JAX reference (lax convs) for validation."""
    C = x.shape[1]
    dw = lax.conv_general_dilated(
        x, w_dw[:, None, :, :], window_strides=(1, 1),
        padding=[(padding, padding), (padding, padding)],
        dimension_numbers=("NCHW", "OIHW", "NCHW"),
        feature_group_count=C, precision=lax.Precision.HIGHEST)
    mean = jnp.mean(dw, axis=(2, 3), keepdims=True)
    var = jnp.mean((dw - mean) ** 2, axis=(2, 3), keepdims=True)
    nrm = (dw - mean) * lax.rsqrt(var + 1e-5)
    act = jnp.where(nrm > 0, nrm, alpha[0] * nrm)
    pw = lax.conv_general_dilated(
        act, w_pw[:, :, None, None], window_strides=(1, 1),
        padding=[(0, 0), (0, 0)],
        dimension_numbers=("NCHW", "OIHW", "NCHW"),
        precision=lax.Precision.HIGHEST)
    return pw


if __name__ == "__main__":
    # Small deterministic config: in_ch=4, out_ch=8, kernel=3, padding=1
    N, IN_CH, OUT_CH, H, W, K, PAD = 2, 4, 8, 16, 16, 3, 1

    key = jax.random.PRNGKey(0)
    kx, kdw, kpw = jax.random.split(key, 3)

    x = jax.random.normal(kx, (N, IN_CH, H, W), dtype=jnp.float32)
    # PyTorch module weight shapes (bias=False):
    #   depthwise Conv2d weight (in_ch, 1, K, K) -> squeezed to (in_ch, K, K)
    #   pointwise Conv2d weight (out_ch, in_ch, 1, 1) -> stored as (out_ch, in_ch)
    w_dw = jax.random.normal(kdw, (IN_CH, K, K), dtype=jnp.float32) * 0.2
    w_pw = jax.random.normal(kpw, (OUT_CH, IN_CH), dtype=jnp.float32) * 0.2
    alpha = jnp.full((1,), 0.25, dtype=jnp.float32)   # nn.PReLU() default init

    out = dwsc_forward(x, w_dw, w_pw, alpha, padding=PAD)
    out = jax.block_until_ready(out)

    ref = _reference(x, w_dw, w_pw, alpha, padding=PAD)
    assert out.shape == (N, OUT_CH, H, W)
    assert jnp.allclose(out, ref, atol=1e-4, rtol=1e-4)

    print("KERNEL_OK")
</pallas_src>

<mosaic_0001>
module attributes {stable_mosaic.version = 11 : i64} {
  func.func @_dwsc_kernel(%arg0: i32, %arg1: memref<4x2x290xf32, #tpu.memory_space<vmem>>, %arg2: memref<36xf32, #tpu.memory_space<smem>>, %arg3: memref<32xf32, #tpu.memory_space<smem>>, %arg4: memref<1xf32, #tpu.memory_space<smem>>, %arg5: memref<3x256xf32, #tpu.memory_space<vmem>>, %arg6: memref<8x2x256xf32, #tpu.memory_space<vmem>>) attributes {dimension_semantics = [#tpu.dimension_semantics<parallel>], iteration_bounds = array<i64: 1>, scalar_prefetch = 0 : i64, scratch_operands = 0 : i64, tpu.core_type = #tpu.core_type<tc>, window_params = [{transform_indices = @transform_0, window_bounds = array<i64: 4, 2, 290>}, {transform_indices = @transform_1, window_bounds = array<i64: 36>}, {transform_indices = @transform_2, window_bounds = array<i64: 32>}, {transform_indices = @transform_3, window_bounds = array<i64: 1>}, {pipeline_mode = #tpu.pipeline_mode<synchronous>, transform_indices = @transform_4, window_bounds = array<i64: 3, 256>}, {transform_indices = @transform_5, window_bounds = array<i64: 8, 2, 256>}]} {
    %c0 = arith.constant 0 : index
    %0 = memref.load %arg4[%c0] : memref<1xf32, #tpu.memory_space<smem>>
    %c0_0 = arith.constant 0 : index
    %c0_1 = arith.constant 0 : index
    %1 = vector.load %arg5[%c0_0, %c0_1] : memref<3x256xf32, #tpu.memory_space<vmem>>, vector<1x256xf32>
    %c2 = arith.constant 2 : index
    %c0_2 = arith.constant 0 : index
    %2 = vector.load %arg5[%c2, %c0_2] : memref<3x256xf32, #tpu.memory_space<vmem>>, vector<1x256xf32>
    %c0_3 = arith.constant 0 : index
    %3 = memref.load %arg2[%c0_3] : memref<36xf32, #tpu.memory_space<smem>>
    %c0_4 = arith.constant 0 : index
    %c0_5 = arith.constant 0 : index
    %c0_6 = arith.constant 0 : index
    %4 = vector.load %arg1[%c0_4, %c0_5, %c0_6] : memref<4x2x290xf32, #tpu.memory_space<vmem>>, vector<1x2x256xf32>
    %5 = vector.shape_cast %4 : vector<1x2x256xf32> to vector<2x256xf32>
    %6 = vector.broadcast %3 : f32 to vector<2x256xf32>
    %7 = arith.mulf %5, %6 : vector<2x256xf32>
    %c3 = arith.constant 3 : index
    %8 = memref.load %arg2[%c3] : memref<36xf32, #tpu.memory_space<smem>>
    %c0_7 = arith.constant 0 : index
    %c0_8 = arith.constant 0 : index
    %c16 = arith.constant 16 : index
    %9 = vector.load %arg1[%c0_7, %c0_8, %c16] : memref<4x2x290xf32, #tpu.memory_space<vmem>>, vector<1x2x256xf32>
    %10 = vector.shape_cast %9 : vector<1x2x256xf32> to vector<2x256xf32>
    %11 = vector.broadcast %8 : f32 to vector<2x256xf32>
    %12 = arith.mulf %10, %11 : vector<2x256xf32>
    %13 = arith.addf %7, %12 : vector<2x256xf32>
    %c6 = arith.constant 6 : index
    %14 = memref.load %arg2[%c6] : memref<36xf32, #tpu.memory_space<smem>>
    %c0_9 = arith.constant 0 : index
    %c0_10 = arith.constant 0 : index
    %c32 = arith.constant 32 : index
    %15 = vector.load %arg1[%c0_9, %c0_10, %c32] : memref<4x2x290xf32, #tpu.memory_space<vmem>>, vector<1x2x256xf32>
    %16 = vector.shape_cast %15 : vector<1x2x256xf32> to vector<2x256xf32>
    %17 = vector.broadcast %14 : f32 to vector<2x256xf32>
    %18 = arith.mulf %16, %17 : vector<2x256xf32>
    %19 = arith.addf %13, %18 : vector<2x256xf32>
    %20 = vector.broadcast %1 : vector<1x256xf32> to vector<2x256xf32>
    %21 = arith.mulf %19, %20 : vector<2x256xf32>
    %c1 = arith.constant 1 : index
    %22 = memref.load %arg2[%c1] : memref<36xf32, #tpu.memory_space<smem>>
    %c0_11 = arith.constant 0 : index
    %c0_12 = arith.constant 0 : index
    %c1_13 = arith.constant 1 : index
    %23 = vector.load %arg1[%c0_11, %c0_12, %c1_13] : memref<4x2x290xf32, #tpu.memory_space<vmem>>, vector<1x2x256xf32>
    %24 = vector.shape_cast %23 : vector<1x2x256xf32> to vector<2x256xf32>
    %25 = vector.broadcast %22 : f32 to vector<2x256xf32>
    %26 = arith.mulf %24, %25 : vector<2x256xf32>
    %c4 = arith.constant 4 : index
    %27 = memref.load %arg2[%c4] : memref<36xf32, #tpu.memory_space<smem>>
    %c0_14 = arith.constant 0 : index
    %c0_15 = arith.constant 0 : index
    %c17 = arith.constant 17 : index
    %28 = vector.load %arg1[%c0_14, %c0_15, %c17] : memref<4x2x290xf32, #tpu.memory_space<vmem>>, vector<1x2x256xf32>
    %29 = vector.shape_cast %28 : vector<1x2x256xf32> to vector<2x256xf32>
    %30 = vector.broadcast %27 : f32 to vector<2x256xf32>
    %31 = arith.mulf %29, %30 : vector<2x256xf32>
    %32 = arith.addf %26, %31 : vector<2x256xf32>
    %c7 = arith.constant 7 : index
    %33 = memref.load %arg2[%c7] : memref<36xf32, #tpu.memory_space<smem>>
    %c0_16 = arith.constant 0 : index
    %c0_17 = arith.constant 0 : index
    %c33 = arith.constant 33 : index
    %34 = vector.load %arg1[%c0_16, %c0_17, %c33] : memref<4x2x290xf32, #tpu.memory_space<vmem>>, vector<1x2x256xf32>
    %35 = vector.shape_cast %34 : vector<1x2x256xf32> to vector<2x256xf32>
    %36 = vector.broadcast %33 : f32 to vector<2x256xf32>
    %37 = arith.mulf %35, %36 : vector<2x256xf32>
    %38 = arith.addf %32, %37 : vector<2x256xf32>
    %39 = arith.addf %21, %38 : vector<2x256xf32>
    %c2_18 = arith.constant 2 : index
    %40 = memref.load %arg2[%c2_18] : memref<36xf32, #tpu.memory_space<smem>>
    %c0_19 = arith.constant 0 : index
    %c0_20 = arith.constant 0 : index
    %c2_21 = arith.constant 2 : index
    %41 = vector.load %arg1[%c0_19, %c0_20, %c2_21] : memref<4x2x290xf32, #tpu.memory_space<vmem>>, vector<1x2x256xf32>
    %42 = vector.shape_cast %41 : vector<1x2x256xf32> to vector<2x256xf32>
    %43 = vector.broadcast %40 : f32 to vector<2x256xf32>
    %44 = arith.mulf %42, %43 : vector<2x256xf32>
    %c5 = arith.constant 5 : index
    %45 = memref.load %arg2[%c5] : memref<36xf32, #tpu.memory_space<smem>>
    %c0_22 = arith.constant 0 : index
    %c0_23 = arith.constant 0 : index
    %c18 = arith.constant 18 : index
    %46 = vector.load %arg1[%c0_22, %c0_23, %c18] : memref<4x2x290xf32, #tpu.memory_space<vmem>>, vector<1x2x256xf32>
    %47 = vector.shape_cast %46 : vector<1x2x256xf32> to vector<2x256xf32>
    %48 = vector.broadcast %45 : f32 to vector<2x256xf32>
    %49 = arith.mulf %47, %48 : vector<2x256xf32>
    %50 = arith.addf %44, %49 : vector<2x256xf32>
    %c8 = arith.constant 8 : index
    %51 = memref.load %arg2[%c8] : memref<36xf32, #tpu.memory_space<smem>>
    %c0_24 = arith.constant 0 : index
    %c0_25 = arith.constant 0 : index
    %c34 = arith.constant 34 : index
    %52 = vector.load %arg1[%c0_24, %c0_25, %c34] : memref<4x2x290xf32, #tpu.memory_space<vmem>>, vector<1x2x256xf32>
    %53 = vector.shape_cast %52 : vector<1x2x256xf32> to vector<2x256xf32>
    %54 = vector.broadcast %51 : f32 to vector<2x256xf32>
    %55 = arith.mulf %53, %54 : vector<2x256xf32>
    %56 = arith.addf %50, %55 : vector<2x256xf32>
    %57 = vector.broadcast %2 : vector<1x256xf32> to vector<2x256xf32>
    %58 = arith.mulf %56, %57 : vector<2x256xf32>
    %59 = arith.addf %39, %58 : vector<2x256xf32>
    %cst = arith.constant dense<0.000000e+00> : vector<2xf32>
    %60 = vector.multi_reduction <add>, %59, %cst [1] : vector<2x256xf32> to vector<2xf32>
    %61 = vector.shape_cast %60 : vector<2xf32> to vector<2x1xf32>
    %cst_26 = arith.constant 3.906250e-03 : f32
    %62 = vector.broadcast %cst_26 : f32 to vector<2x1xf32>
    %63 = arith.mulf %61, %62 : vector<2x1xf32>
    %64 = vector.broadcast %63 : vector<2x1xf32> to vector<2x256xf32>
    %65 = arith.subf %59, %64 : vector<2x256xf32>
    %66 = arith.mulf %65, %65 : vector<2x256xf32>
    %cst_27 = arith.constant dense<0.000000e+00> : vector<2xf32>
    %67 = vector.multi_reduction <add>, %66, %cst_27 [1] : vector<2x256xf32> to vector<2xf32>
    %68 = vector.shape_cast %67 : vector<2xf32> to vector<2x1xf32>
    %cst_28 = arith.constant 3.906250e-03 : f32
    %69 = vector.broadcast %cst_28 : f32 to vector<2x1xf32>
    %70 = arith.mulf %68, %69 : vector<2x1xf32>
    %cst_29 = arith.constant 9.99999974E-6 : f32
    %71 = vector.broadcast %cst_29 : f32 to vector<2x1xf32>
    %72 = arith.addf %70, %71 : vector<2x1xf32>
    %73 = math.rsqrt %72 : vector<2x1xf32>
    %74 = vector.broadcast %73 : vector<2x1xf32> to vector<2x256xf32>
    %75 = arith.mulf %65, %74 : vector<2x256xf32>
    %cst_30 = arith.constant 0.000000e+00 : f32
    %76 = vector.broadcast %cst_30 : f32 to vector<2x256xf32>
    %77 = arith.cmpf ogt, %75, %76 : vector<2x256xf32>
    %78 = vector.broadcast %0 : f32 to vector<2x256xf32>
    %79 = arith.mulf %78, %75 : vector<2x256xf32>
    %80 = arith.select %77, %75, %79 : vector<2x256xi1>, vector<2x256xf32>
    %c9 = arith.constant 9 : index
    %81 = memref.load %arg2[%c9] : memref<36xf32, #tpu.memory_space<smem>>
    %c1_31 = arith.constant 1 : index
    %c0_32 = arith.constant 0 : index
    %c0_33 = arith.constant 0 : index
    %82 = vector.load %arg1[%c1_31, %c0_32, %c0_33] : memref<4x2x290xf32, #tpu.memory_space<vmem>>, vector<1x2x256xf32>
    %83 = vector.shape_cast %82 : vector<1x2x256xf32> to vector<2x256xf32>
    %84 = vector.broadcast %81 : f32 to vector<2x256xf32>
    %85 = arith.mulf %83, %84 : vector<2x256xf32>
    %c12 = arith.constant 12 : index
    %86 = memref.load %arg2[%c12] : memref<36xf32, #tpu.memory_space<smem>>
    %c1_34 = arith.constant 1 : index
    %c0_35 = arith.constant 0 : index
    %c16_36 = arith.constant 16 : index
    %87 = vector.load %arg1[%c1_34, %c0_35, %c16_36] : memref<4x2x290xf32, #tpu.memory_space<vmem>>, vector<1x2x256xf32>
    %88 = vector.shape_cast %87 : vector<1x2x256xf32> to vector<2x256xf32>
    %89 = vector.broadcast %86 : f32 to vector<2x256xf32>
    %90 = arith.mulf %88, %89 : vector<2x256xf32>
    %91 = arith.addf %85, %90 : vector<2x256xf32>
    %c15 = arith.constant 15 : index
    %92 = memref.load %arg2[%c15] : memref<36xf32, #tpu.memory_space<smem>>
    %c1_37 = arith.constant 1 : index
    %c0_38 = arith.constant 0 : index
    %c32_39 = arith.constant 32 : index
    %93 = vector.load %arg1[%c1_37, %c0_38, %c32_39] : memref<4x2x290xf32, #tpu.memory_space<vmem>>, vector<1x2x256xf32>
    %94 = vector.shape_cast %93 : vector<1x2x256xf32> to vector<2x256xf32>
    %95 = vector.broadcast %92 : f32 to vector<2x256xf32>
    %96 = arith.mulf %94, %95 : vector<2x256xf32>
    %97 = arith.addf %91, %96 : vector<2x256xf32>
    %98 = vector.broadcast %1 : vector<1x256xf32> to vector<2x256xf32>
    %99 = arith.mulf %97, %98 : vector<2x256xf32>
    %c10 = arith.constant 10 : index
    %100 = memref.load %arg2[%c10] : memref<36xf32, #tpu.memory_space<smem>>
    %c1_40 = arith.constant 1 : index
    %c0_41 = arith.constant 0 : index
    %c1_42 = arith.constant 1 : index
    %101 = vector.load %arg1[%c1_40, %c0_41, %c1_42] : memref<4x2x290xf32, #tpu.memory_space<vmem>>, vector<1x2x256xf32>
    %102 = vector.shape_cast %101 : vector<1x2x256xf32> to vector<2x256xf32>
    %103 = vector.broadcast %100 : f32 to vector<2x256xf32>
    %104 = arith.mulf %102, %103 : vector<2x256xf32>
    %c13 = arith.constant 13 : index
    %105 = memref.load %arg2[%c13] : memref<36xf32, #tpu.memory_space<smem>>
    %c1_43 = arith.constant 1 : index
    %c0_44 = arith.constant 0 : index
    %c17_45 = arith.constant 17 : index
    %106 = vector.load %arg1[%c1_43, %c0_44, %c17_45] : memref<4x2x290xf32, #tpu.memory_space<vmem>>, vector<1x2x256xf32>
    %107 = vector.shape_cast %106 : vector<1x2x256xf32> to vector<2x256xf32>
    %108 = vector.broadcast %105 : f32 to vector<2x256xf32>
    %109 = arith.mulf %107, %108 : vector<2x256xf32>
    %110 = arith.addf %104, %109 : vector<2x256xf32>
    %c16_46 = arith.constant 16 : index
    %111 = memref.load %arg2[%c16_46] : memref<36xf32, #tpu.memory_space<smem>>
    %c1_47 = arith.constant 1 : index
    %c0_48 = arith.constant 0 : index
    %c33_49 = arith.constant 33 : index
    %112 = vector.load %arg1[%c1_47, %c0_48, %c33_49] : memref<4x2x290xf32, #tpu.memory_space<vmem>>, vector<1x2x256xf32>
    %113 = vector.shape_cast %112 : vector<1x2x256xf32> to vector<2x256xf32>
    %114 = vector.broadcast %111 : f32 to vector<2x256xf32>
    %115 = arith.mulf %113, %114 : vector<2x256xf32>
    %116 = arith.addf %110, %115 : vector<2x256xf32>
    %117 = arith.addf %99, %116 : vector<2x256xf32>
    %c11 = arith.constant 11 : index
    %118 = memref.load %arg2[%c11] : memref<36xf32, #tpu.memory_space<smem>>
    %c1_50 = arith.constant 1 : index
    %c0_51 = arith.constant 0 : index
    %c2_52 = arith.constant 2 : index
    %119 = vector.load %arg1[%c1_50, %c0_51, %c2_52] : memref<4x2x290xf32, #tpu.memory_space<vmem>>, vector<1x2x256xf32>
    %120 = vector.shape_cast %119 : vector<1x2x256xf32> to vector<2x256xf32>
    %121 = vector.broadcast %118 : f32 to vector<2x256xf32>
    %122 = arith.mulf %120, %121 : vector<2x256xf32>
    %c14 = arith.constant 14 : index
    %123 = memref.load %arg2[%c14] : memref<36xf32, #tpu.memory_space<smem>>
    %c1_53 = arith.constant 1 : index
    %c0_54 = arith.constant 0 : index
    %c18_55 = arith.constant 18 : index
    %124 = vector.load %arg1[%c1_53, %c0_54, %c18_55] : memref<4x2x290xf32, #tpu.memory_space<vmem>>, vector<1x2x256xf32>
    %125 = vector.shape_cast %124 : vector<1x2x256xf32> to vector<2x256xf32>
    %126 = vector.broadcast %123 : f32 to vector<2x256xf32>
    %127 = arith.mulf %125, %126 : vector<2x256xf32>
    %128 = arith.addf %122, %127 : vector<2x256xf32>
    %c17_56 = arith.constant 17 : index
    %129 = memref.load %arg2[%c17_56] : memref<36xf32, #tpu.memory_space<smem>>
    %c1_57 = arith.constant 1 : index
    %c0_58 = arith.constant 0 : index
    %c34_59 = arith.constant 34 : index
    %130 = vector.load %arg1[%c1_57, %c0_58, %c34_59] : memref<4x2x290xf32, #tpu.memory_space<vmem>>, vector<1x2x256xf32>
    %131 = vector.shape_cast %130 : vector<1x2x256xf32> to vector<2x256xf32>
    %132 = vector.broadcast %129 : f32 to vector<2x256xf32>
    %133 = arith.mulf %131, %132 : vector<2x256xf32>
    %134 = arith.addf %128, %133 : vector<2x256xf32>
    %135 = vector.broadcast %2 : vector<1x256xf32> to vector<2x256xf32>
    %136 = arith.mulf %134, %135 : vector<2x256xf32>
    %137 = arith.addf %117, %136 : vector<2x256xf32>
    %cst_60 = arith.constant dense<0.000000e+00> : vector<2xf32>
    %138 = vector.multi_reduction <add>, %137, %cst_60 [1] : vector<2x256xf32> to vector<2xf32>
    %139 = vector.shape_cast %138 : vector<2xf32> to vector<2x1xf32>
    %cst_61 = arith.constant 3.906250e-03 : f32
    %140 = vector.broadcast %cst_61 : f32 to vector<2x1xf32>
    %141 = arith.mulf %139, %140 : vector<2x1xf32>
    %142 = vector.broadcast %141 : vector<2x1xf32> to vector<2x256xf32>
    %143 = arith.subf %137, %142 : vector<2x256xf32>
    %144 = arith.mulf %143, %143 : vector<2x256xf32>
    %cst_62 = arith.constant dense<0.000000e+00> : vector<2xf32>
    %145 = vector.multi_reduction <add>, %144, %cst_62 [1] : vector<2x256xf32> to vector<2xf32>
    %146 = vector.shape_cast %145 : vector<2xf32> to vector<2x1xf32>
    %cst_63 = arith.constant 3.906250e-03 : f32
    %147 = vector.broadcast %cst_63 : f32 to vector<2x1xf32>
    %148 = arith.mulf %146, %147 : vector<2x1xf32>
    %cst_64 = arith.constant 9.99999974E-6 : f32
    %149 = vector.broadcast %cst_64 : f32 to vector<2x1xf32>
    %150 = arith.addf %148, %149 : vector<2x1xf32>
    %151 = math.rsqrt %150 : vector<2x1xf32>
    %152 = vector.broadcast %151 : vector<2x1xf32> to vector<2x256xf32>
    %153 = arith.mulf %143, %152 : vector<2x256xf32>
    %cst_65 = arith.constant 0.000000e+00 : f32
    %154 = vector.broadcast %cst_65 : f32 to vector<2x256xf32>
    %155 = arith.cmpf ogt, %153, %154 : vector<2x256xf32>
    %156 = vector.broadcast %0 : f32 to vector<2x256xf32>
    %157 = arith.mulf %156, %153 : vector<2x256xf32>
    %158 = arith.select %155, %153, %157 : vector<2x256xi1>, vector<2x256xf32>
    %c18_66 = arith.constant 18 : index
    %159 = memref.load %arg2[%c18_66] : memref<36xf32, #tpu.memory_space<smem>>
    %c2_67 = arith.constant 2 : index
    %c0_68 = arith.constant 0 : index
    %c0_69 = arith.constant 0 : index
    %160 = vector.load %arg1[%c2_67, %c0_68, %c0_69] : memref<4x2x290xf32, #tpu.memory_space<vmem>>, vector<1x2x256xf32>
    %161 = vector.shape_cast %160 : vector<1x2x256xf32> to vector<2x256xf32>
    %162 = vector.broadcast %159 : f32 to vector<2x256xf32>
    %163 = arith.mulf %161, %162 : vector<2x256xf32>
    %c21 = arith.constant 21 : index
    %164 = memref.load %arg2[%c21] : memref<36xf32, #tpu.memory_space<smem>>
    %c2_70 = arith.constant 2 : index
    %c0_71 = arith.constant 0 : index
    %c16_72 = arith.constant 16 : index
    %165 = vector.load %arg1[%c2_70, %c0_71, %c16_72] : memref<4x2x290xf32, #tpu.memory_space<vmem>>, vector<1x2x256xf32>
    %166 = vector.shape_cast %165 : vector<1x2x256xf32> to vector<2x256xf32>
    %167 = vector.broadcast %164 : f32 to vector<2x256xf32>
    %168 = arith.mulf %166, %167 : vector<2x256xf32>
    %169 = arith.addf %163, %168 : vector<2x256xf32>
    %c24 = arith.constant 24 : index
    %170 = memref.load %arg2[%c24] : memref<36xf32, #tpu.memory_space<smem>>
    %c2_73 = arith.constant 2 : index
    %c0_74 = arith.constant 0 : index
    %c32_75 = arith.constant 32 : index
    %171 = vector.load %arg1[%c2_73, %c0_74, %c32_75] : memref<4x2x290xf32, #tpu.memory_space<vmem>>, vector<1x2x256xf32>
    %172 = vector.shape_cast %171 : vector<1x2x256xf32> to vector<2x256xf32>
    %173 = vector.broadcast %170 : f32 to vector<2x256xf32>
    %174 = arith.mulf %172, %173 : vector<2x256xf32>
    %175 = arith.addf %169, %174 : vector<2x256xf32>
    %176 = vector.broadcast %1 : vector<1x256xf32> to vector<2x256xf32>
    %177 = arith.mulf %175, %176 : vector<2x256xf32>
    %c19 = arith.constant 19 : index
    %178 = memref.load %arg2[%c19] : memref<36xf32, #tpu.memory_space<smem>>
    %c2_76 = arith.constant 2 : index
    %c0_77 = arith.constant 0 : index
    %c1_78 = arith.constant 1 : index
    %179 = vector.load %arg1[%c2_76, %c0_77, %c1_78] : memref<4x2x290xf32, #tpu.memory_space<vmem>>, vector<1x2x256xf32>
    %180 = vector.shape_cast %179 : vector<1x2x256xf32> to vector<2x256xf32>
    %181 = vector.broadcast %178 : f32 to vector<2x256xf32>
    %182 = arith.mulf %180, %181 : vector<2x256xf32>
    %c22 = arith.constant 22 : index
    %183 = memref.load %arg2[%c22] : memref<36xf32, #tpu.memory_space<smem>>
    %c2_79 = arith.constant 2 : index
    %c0_80 = arith.constant 0 : index
    %c17_81 = arith.constant 17 : index
    %184 = vector.load %arg1[%c2_79, %c0_80, %c17_81] : memref<4x2x290xf32, #tpu.memory_space<vmem>>, vector<1x2x256xf32>
    %185 = vector.shape_cast %184 : vector<1x2x256xf32> to vector<2x256xf32>
    %186 = vector.broadcast %183 : f32 to vector<2x256xf32>
    %187 = arith.mulf %185, %186 : vector<2x256xf32>
    %188 = arith.addf %182, %187 : vector<2x256xf32>
    %c25 = arith.constant 25 : index
    %189 = memref.load %arg2[%c25] : memref<36xf32, #tpu.memory_space<smem>>
    %c2_82 = arith.constant 2 : index
    %c0_83 = arith.constant 0 : index
    %c33_84 = arith.constant 33 : index
    %190 = vector.load %arg1[%c2_82, %c0_83, %c33_84] : memref<4x2x290xf32, #tpu.memory_space<vmem>>, vector<1x2x256xf32>
    %191 = vector.shape_cast %190 : vector<1x2x256xf32> to vector<2x256xf32>
    %192 = vector.broadcast %189 : f32 to vector<2x256xf32>
    %193 = arith.mulf %191, %192 : vector<2x256xf32>
    %194 = arith.addf %188, %193 : vector<2x256xf32>
    %195 = arith.addf %177, %194 : vector<2x256xf32>
    %c20 = arith.constant 20 : index
    %196 = memref.load %arg2[%c20] : memref<36xf32, #tpu.memory_space<smem>>
    %c2_85 = arith.constant 2 : index
    %c0_86 = arith.constant 0 : index
    %c2_87 = arith.constant 2 : index
    %197 = vector.load %arg1[%c2_85, %c0_86, %c2_87] : memref<4x2x290xf32, #tpu.memory_space<vmem>>, vector<1x2x256xf32>
    %198 = vector.shape_cast %197 : vector<1x2x256xf32> to vector<2x256xf32>
    %199 = vector.broadcast %196 : f32 to vector<2x256xf32>
    %200 = arith.mulf %198, %199 : vector<2x256xf32>
    %c23 = arith.constant 23 : index
    %201 = memref.load %arg2[%c23] : memref<36xf32, #tpu.memory_space<smem>>
    %c2_88 = arith.constant 2 : index
    %c0_89 = arith.constant 0 : index
    %c18_90 = arith.constant 18 : index
    %202 = vector.load %arg1[%c2_88, %c0_89, %c18_90] : memref<4x2x290xf32, #tpu.memory_space<vmem>>, vector<1x2x256xf32>
    %203 = vector.shape_cast %202 : vector<1x2x256xf32> to vector<2x256xf32>
    %204 = vector.broadcast %201 : f32 to vector<2x256xf32>
    %205 = arith.mulf %203, %204 : vector<2x256xf32>
    %206 = arith.addf %200, %205 : vector<2x256xf32>
    %c26 = arith.constant 26 : index
    %207 = memref.load %arg2[%c26] : memref<36xf32, #tpu.memory_space<smem>>
    %c2_91 = arith.constant 2 : index
    %c0_92 = arith.constant 0 : index
    %c34_93 = arith.constant 34 : index
    %208 = vector.load %arg1[%c2_91, %c0_92, %c34_93] : memref<4x2x290xf32, #tpu.memory_space<vmem>>, vector<1x2x256xf32>
    %209 = vector.shape_cast %208 : vector<1x2x256xf32> to vector<2x256xf32>
    %210 = vector.broadcast %207 : f32 to vector<2x256xf32>
    %211 = arith.mulf %209, %210 : vector<2x256xf32>
    %212 = arith.addf %206, %211 : vector<2x256xf32>
    %213 = vector.broadcast %2 : vector<1x256xf32> to vector<2x256xf32>
    %214 = arith.mulf %212, %213 : vector<2x256xf32>
    %215 = arith.addf %195, %214 : vector<2x256xf32>
    %cst_94 = arith.constant dense<0.000000e+00> : vector<2xf32>
    %216 = vector.multi_reduction <add>, %215, %cst_94 [1] : vector<2x256xf32> to vector<2xf32>
    %217 = vector.shape_cast %216 : vector<2xf32> to vector<2x1xf32>
    %cst_95 = arith.constant 3.906250e-03 : f32
    %218 = vector.broadcast %cst_95 : f32 to vector<2x1xf32>
    %219 = arith.mulf %217, %218 : vector<2x1xf32>
    %220 = vector.broadcast %219 : vector<2x1xf32> to vector<2x256xf32>
    %221 = arith.subf %215, %220 : vector<2x256xf32>
    %222 = arith.mulf %221, %221 : vector<2x256xf32>
    %cst_96 = arith.constant dense<0.000000e+00> : vector<2xf32>
    %223 = vector.multi_reduction <add>, %222, %cst_96 [1] : vector<2x256xf32> to vector<2xf32>
    %224 = vector.shape_cast %223 : vector<2xf32> to vector<2x1xf32>
    %cst_97 = arith.constant 3.906250e-03 : f32
    %225 = vector.broadcast %cst_97 : f32 to vector<2x1xf32>
    %226 = arith.mulf %224, %225 : vector<2x1xf32>
    %cst_98 = arith.constant 9.99999974E-6 : f32
    %227 = vector.broadcast %cst_98 : f32 to vector<2x1xf32>
    %228 = arith.addf %226, %227 : vector<2x1xf32>
    %229 = math.rsqrt %228 : vector<2x1xf32>
    %230 = vector.broadcast %229 : vector<2x1xf32> to vector<2x256xf32>
    %231 = arith.mulf %221, %230 : vector<2x256xf32>
    %cst_99 = arith.constant 0.000000e+00 : f32
    %232 = vector.broadcast %cst_99 : f32 to vector<2x256xf32>
    %233 = arith.cmpf ogt, %231, %232 : vector<2x256xf32>
    %234 = vector.broadcast %0 : f32 to vector<2x256xf32>
    %235 = arith.mulf %234, %231 : vector<2x256xf32>
    %236 = arith.select %233, %231, %235 : vector<2x256xi1>, vector<2x256xf32>
    %c27 = arith.constant 27 : index
    %237 = memref.load %arg2[%c27] : memref<36xf32, #tpu.memory_space<smem>>
    %c3_100 = arith.constant 3 : index
    %c0_101 = arith.constant 0 : index
    %c0_102 = arith.constant 0 : index
    %238 = vector.load %arg1[%c3_100, %c0_101, %c0_102] : memref<4x2x290xf32, #tpu.memory_space<vmem>>, vector<1x2x256xf32>
    %239 = vector.shape_cast %238 : vector<1x2x256xf32> to vector<2x256xf32>
    %240 = vector.broadcast %237 : f32 to vector<2x256xf32>
    %241 = arith.mulf %239, %240 : vector<2x256xf32>
    %c30 = arith.constant 30 : index
    %242 = memref.load %arg2[%c30] : memref<36xf32, #tpu.memory_space<smem>>
    %c3_103 = arith.constant 3 : index
    %c0_104 = arith.constant 0 : index
    %c16_105 = arith.constant 16 : index
    %243 = vector.load %arg1[%c3_103, %c0_104, %c16_105] : memref<4x2x290xf32, #tpu.memory_space<vmem>>, vector<1x2x256xf32>
    %244 = vector.shape_cast %243 : vector<1x2x256xf32> to vector<2x256xf32>
    %245 = vector.broadcast %242 : f32 to vector<2x256xf32>
    %246 = arith.mulf %244, %245 : vector<2x256xf32>
    %247 = arith.addf %241, %246 : vector<2x256xf32>
    %c33_106 = arith.constant 33 : index
    %248 = memref.load %arg2[%c33_106] : memref<36xf32, #tpu.memory_space<smem>>
    %c3_107 = arith.constant 3 : index
    %c0_108 = arith.constant 0 : index
    %c32_109 = arith.constant 32 : index
    %249 = vector.load %arg1[%c3_107, %c0_108, %c32_109] : memref<4x2x290xf32, #tpu.memory_space<vmem>>, vector<1x2x256xf32>
    %250 = vector.shape_cast %249 : vector<1x2x256xf32> to vector<2x256xf32>
    %251 = vector.broadcast %248 : f32 to vector<2x256xf32>
    %252 = arith.mulf %250, %251 : vector<2x256xf32>
    %253 = arith.addf %247, %252 : vector<2x256xf32>
    %254 = vector.broadcast %1 : vector<1x256xf32> to vector<2x256xf32>
    %255 = arith.mulf %253, %254 : vector<2x256xf32>
    %c28 = arith.constant 28 : index
    %256 = memref.load %arg2[%c28] : memref<36xf32, #tpu.memory_space<smem>>
    %c3_110 = arith.constant 3 : index
    %c0_111 = arith.constant 0 : index
    %c1_112 = arith.constant 1 : index
    %257 = vector.load %arg1[%c3_110, %c0_111, %c1_112] : memref<4x2x290xf32, #tpu.memory_space<vmem>>, vector<1x2x256xf32>
    %258 = vector.shape_cast %257 : vector<1x2x256xf32> to vector<2x256xf32>
    %259 = vector.broadcast %256 : f32 to vector<2x256xf32>
    %260 = arith.mulf %258, %259 : vector<2x256xf32>
    %c31 = arith.constant 31 : index
    %261 = memref.load %arg2[%c31] : memref<36xf32, #tpu.memory_space<smem>>
    %c3_113 = arith.constant 3 : index
    %c0_114 = arith.constant 0 : index
    %c17_115 = arith.constant 17 : index
    %262 = vector.load %arg1[%c3_113, %c0_114, %c17_115] : memref<4x2x290xf32, #tpu.memory_space<vmem>>, vector<1x2x256xf32>
    %263 = vector.shape_cast %262 : vector<1x2x256xf32> to vector<2x256xf32>
    %264 = vector.broadcast %261 : f32 to vector<2x256xf32>
    %265 = arith.mulf %263, %264 : vector<2x256xf32>
    %266 = arith.addf %260, %265 : vector<2x256xf32>
    %c34_116 = arith.constant 34 : index
    %267 = memref.load %arg2[%c34_116] : memref<36xf32, #tpu.memory_space<smem>>
    %c3_117 = arith.constant 3 : index
    %c0_118 = arith.constant 0 : index
    %c33_119 = arith.constant 33 : index
    %268 = vector.load %arg1[%c3_117, %c0_118, %c33_119] : memref<4x2x290xf32, #tpu.memory_space<vmem>>, vector<1x2x256xf32>
    %269 = vector.shape_cast %268 : vector<1x2x256xf32> to vector<2x256xf32>
    %270 = vector.broadcast %267 : f32 to vector<2x256xf32>
    %271 = arith.mulf %269, %270 : vector<2x256xf32>
    %272 = arith.addf %266, %271 : vector<2x256xf32>
    %273 = arith.addf %255, %272 : vector<2x256xf32>
    %c29 = arith.constant 29 : index
    %274 = memref.load %arg2[%c29] : memref<36xf32, #tpu.memory_space<smem>>
    %c3_120 = arith.constant 3 : index
    %c0_121 = arith.constant 0 : index
    %c2_122 = arith.constant 2 : index
    %275 = vector.load %arg1[%c3_120, %c0_121, %c2_122] : memref<4x2x290xf32, #tpu.memory_space<vmem>>, vector<1x2x256xf32>
    %276 = vector.shape_cast %275 : vector<1x2x256xf32> to vector<2x256xf32>
    %277 = vector.broadcast %274 : f32 to vector<2x256xf32>
    %278 = arith.mulf %276, %277 : vector<2x256xf32>
    %c32_123 = arith.constant 32 : index
    %279 = memref.load %arg2[%c32_123] : memref<36xf32, #tpu.memory_space<smem>>
    %c3_124 = arith.constant 3 : index
    %c0_125 = arith.constant 0 : index
    %c18_126 = arith.constant 18 : index
    %280 = vector.load %arg1[%c3_124, %c0_125, %c18_126] : memref<4x2x290xf32, #tpu.memory_space<vmem>>, vector<1x2x256xf32>
    %281 = vector.shape_cast %280 : vector<1x2x256xf32> to vector<2x256xf32>
    %282 = vector.broadcast %279 : f32 to vector<2x256xf32>
    %283 = arith.mulf %281, %282 : vector<2x256xf32>
    %284 = arith.addf %278, %283 : vector<2x256xf32>
    %c35 = arith.constant 35 : index
    %285 = memref.load %arg2[%c35] : memref<36xf32, #tpu.memory_space<smem>>
    %c3_127 = arith.constant 3 : index
    %c0_128 = arith.constant 0 : index
    %c34_129 = arith.constant 34 : index
    %286 = vector.load %arg1[%c3_127, %c0_128, %c34_129] : memref<4x2x290xf32, #tpu.memory_space<vmem>>, vector<1x2x256xf32>
    %287 = vector.shape_cast %286 : vector<1x2x256xf32> to vector<2x256xf32>
    %288 = vector.broadcast %285 : f32 to vector<2x256xf32>
    %289 = arith.mulf %287, %288 : vector<2x256xf32>
    %290 = arith.addf %284, %289 : vector<2x256xf32>
    %291 = vector.broadcast %2 : vector<1x256xf32> to vector<2x256xf32>
    %292 = arith.mulf %290, %291 : vector<2x256xf32>
    %293 = arith.addf %273, %292 : vector<2x256xf32>
    %cst_130 = arith.constant dense<0.000000e+00> : vector<2xf32>
    %294 = vector.multi_reduction <add>, %293, %cst_130 [1] : vector<2x256xf32> to vector<2xf32>
    %295 = vector.shape_cast %294 : vector<2xf32> to vector<2x1xf32>
    %cst_131 = arith.constant 3.906250e-03 : f32
    %296 = vector.broadcast %cst_131 : f32 to vector<2x1xf32>
    %297 = arith.mulf %295, %296 : vector<2x1xf32>
    %298 = vector.broadcast %297 : vector<2x1xf32> to vector<2x256xf32>
    %299 = arith.subf %293, %298 : vector<2x256xf32>
    %300 = arith.mulf %299, %299 : vector<2x256xf32>
    %cst_132 = arith.constant dense<0.000000e+00> : vector<2xf32>
    %301 = vector.multi_reduction <add>, %300, %cst_132 [1] : vector<2x256xf32> to vector<2xf32>
    %302 = vector.shape_cast %301 : vector<2xf32> to vector<2x1xf32>
    %cst_133 = arith.constant 3.906250e-03 : f32
    %303 = vector.broadcast %cst_133 : f32 to vector<2x1xf32>
    %304 = arith.mulf %302, %303 : vector<2x1xf32>
    %cst_134 = arith.constant 9.99999974E-6 : f32
    %305 = vector.broadcast %cst_134 : f32 to vector<2x1xf32>
    %306 = arith.addf %304, %305 : vector<2x1xf32>
    %307 = math.rsqrt %306 : vector<2x1xf32>
    %308 = vector.broadcast %307 : vector<2x1xf32> to vector<2x256xf32>
    %309 = arith.mulf %299, %308 : vector<2x256xf32>
    %cst_135 = arith.constant 0.000000e+00 : f32
    %310 = vector.broadcast %cst_135 : f32 to vector<2x256xf32>
    %311 = arith.cmpf ogt, %309, %310 : vector<2x256xf32>
    %312 = vector.broadcast %0 : f32 to vector<2x256xf32>
    %313 = arith.mulf %312, %309 : vector<2x256xf32>
    %314 = arith.select %311, %309, %313 : vector<2x256xi1>, vector<2x256xf32>
    %c0_136 = arith.constant 0 : index
    %315 = memref.load %arg3[%c0_136] : memref<32xf32, #tpu.memory_space<smem>>
    %316 = vector.broadcast %315 : f32 to vector<2x256xf32>
    %317 = arith.mulf %80, %316 : vector<2x256xf32>
    %c1_137 = arith.constant 1 : index
    %318 = memref.load %arg3[%c1_137] : memref<32xf32, #tpu.memory_space<smem>>
    %319 = vector.broadcast %318 : f32 to vector<2x256xf32>
    %320 = arith.mulf %158, %319 : vector<2x256xf32>
    %321 = arith.addf %317, %320 : vector<2x256xf32>
    %c2_138 = arith.constant 2 : index
    %322 = memref.load %arg3[%c2_138] : memref<32xf32, #tpu.memory_space<smem>>
    %323 = vector.broadcast %322 : f32 to vector<2x256xf32>
    %324 = arith.mulf %236, %323 : vector<2x256xf32>
    %325 = arith.addf %321, %324 : vector<2x256xf32>
    %c3_139 = arith.constant 3 : index
    %326 = memref.load %arg3[%c3_139] : memref<32xf32, #tpu.memory_space<smem>>
    %327 = vector.broadcast %326 : f32 to vector<2x256xf32>
    %328 = arith.mulf %314, %327 : vector<2x256xf32>
    %329 = arith.addf %325, %328 : vector<2x256xf32>
    %c0_140 = arith.constant 0 : index
    %c0_141 = arith.constant 0 : index
    %c0_142 = arith.constant 0 : index
    %330 = vector.load %arg6[%c0_140, %c0_141, %c0_142] : memref<8x2x256xf32, #tpu.memory_space<vmem>>, vector<1x2x256xf32>
    %331 = vector.shape_cast %330 : vector<1x2x256xf32> to vector<2x256xf32>
    %332 = vector.shape_cast %329 : vector<2x256xf32> to vector<1x2x256xf32>
    tpu.vector_store %arg6[%c0_140, %c0_141, %c0_142], %332 {strides = array<i32>} : memref<8x2x256xf32, #tpu.memory_space<vmem>>, vector<1x2x256xf32>,
    %c4_143 = arith.constant 4 : index
    %333 = memref.load %arg3[%c4_143] : memref<32xf32, #tpu.memory_space<smem>>
    %334 = vector.broadcast %333 : f32 to vector<2x256xf32>
    %335 = arith.mulf %80, %334 : vector<2x256xf32>
    %c5_144 = arith.constant 5 : index
    %336 = memref.load %arg3[%c5_144] : memref<32xf32, #tpu.memory_space<smem>>
    %337 = vector.broadcast %336 : f32 to vector<2x256xf32>
    %338 = arith.mulf %158, %337 : vector<2x256xf32>
    %339 = arith.addf %335, %338 : vector<2x256xf32>
    %c6_145 = arith.constant 6 : index
    %340 = memref.load %arg3[%c6_145] : memref<32xf32, #tpu.memory_space<smem>>
    %341 = vector.broadcast %340 : f32 to vector<2x256xf32>
    %342 = arith.mulf %236, %341 : vector<2x256xf32>
    %343 = arith.addf %339, %342 : vector<2x256xf32>
    %c7_146 = arith.constant 7 : index
    %344 = memref.load %arg3[%c7_146] : memref<32xf32, #tpu.memory_space<smem>>
    %345 = vector.broadcast %344 : f32 to vector<2x256xf32>
    %346 = arith.mulf %314, %345 : vector<2x256xf32>
    %347 = arith.addf %343, %346 : vector<2x256xf32>
    %c1_147 = arith.constant 1 : index
    %c0_148 = arith.constant 0 : index
    %c0_149 = arith.constant 0 : index
    %348 = vector.load %arg6[%c1_147, %c0_148, %c0_149] : memref<8x2x256xf32, #tpu.memory_space<vmem>>, vector<1x2x256xf32>
    %349 = vector.shape_cast %348 : vector<1x2x256xf32> to vector<2x256xf32>
    %350 = vector.shape_cast %347 : vector<2x256xf32> to vector<1x2x256xf32>
    tpu.vector_store %arg6[%c1_147, %c0_148, %c0_149], %350 {strides = array<i32>} : memref<8x2x256xf32, #tpu.memory_space<vmem>>, vector<1x2x256xf32>,
    %c8_150 = arith.constant 8 : index
    %351 = memref.load %arg3[%c8_150] : memref<32xf32, #tpu.memory_space<smem>>
    %352 = vector.broadcast %351 : f32 to vector<2x256xf32>
    %353 = arith.mulf %80, %352 : vector<2x256xf32>
    %c9_151 = arith.constant 9 : index
    %354 = memref.load %arg3[%c9_151] : memref<32xf32, #tpu.memory_space<smem>>
    %355 = vector.broadcast %354 : f32 to vector<2x256xf32>
    %356 = arith.mulf %158, %355 : vector<2x256xf32>
    %357 = arith.addf %353, %356 : vector<2x256xf32>
    %c10_152 = arith.constant 10 : index
    %358 = memref.load %arg3[%c10_152] : memref<32xf32, #tpu.memory_space<smem>>
    %359 = vector.broadcast %358 : f32 to vector<2x256xf32>
    %360 = arith.mulf %236, %359 : vector<2x256xf32>
    %361 = arith.addf %357, %360 : vector<2x256xf32>
    %c11_153 = arith.constant 11 : index
    %362 = memref.load %arg3[%c11_153] : memref<32xf32, #tpu.memory_space<smem>>
    %363 = vector.broadcast %362 : f32 to vector<2x256xf32>
    %364 = arith.mulf %314, %363 : vector<2x256xf32>
    %365 = arith.addf %361, %364 : vector<2x256xf32>
    %c2_154 = arith.constant 2 : index
    %c0_155 = arith.constant 0 : index
    %c0_156 = arith.constant 0 : index
    %366 = vector.load %arg6[%c2_154, %c0_155, %c0_156] : memref<8x2x256xf32, #tpu.memory_space<vmem>>, vector<1x2x256xf32>
    %367 = vector.shape_cast %366 : vector<1x2x256xf32> to vector<2x256xf32>
    %368 = vector.shape_cast %365 : vector<2x256xf32> to vector<1x2x256xf32>
    tpu.vector_store %arg6[%c2_154, %c0_155, %c0_156], %368 {strides = array<i32>} : memref<8x2x256xf32, #tpu.memory_space<vmem>>, vector<1x2x256xf32>,
    %c12_157 = arith.constant 12 : index
    %369 = memref.load %arg3[%c12_157] : memref<32xf32, #tpu.memory_space<smem>>
    %370 = vector.broadcast %369 : f32 to vector<2x256xf32>
    %371 = arith.mulf %80, %370 : vector<2x256xf32>
    %c13_158 = arith.constant 13 : index
    %372 = memref.load %arg3[%c13_158] : memref<32xf32, #tpu.memory_space<smem>>
    %373 = vector.broadcast %372 : f32 to vector<2x256xf32>
    %374 = arith.mulf %158, %373 : vector<2x256xf32>
    %375 = arith.addf %371, %374 : vector<2x256xf32>
    %c14_159 = arith.constant 14 : index
    %376 = memref.load %arg3[%c14_159] : memref<32xf32, #tpu.memory_space<smem>>
    %377 = vector.broadcast %376 : f32 to vector<2x256xf32>
    %378 = arith.mulf %236, %377 : vector<2x256xf32>
    %379 = arith.addf %375, %378 : vector<2x256xf32>
    %c15_160 = arith.constant 15 : index
    %380 = memref.load %arg3[%c15_160] : memref<32xf32, #tpu.memory_space<smem>>
    %381 = vector.broadcast %380 : f32 to vector<2x256xf32>
    %382 = arith.mulf %314, %381 : vector<2x256xf32>
    %383 = arith.addf %379, %382 : vector<2x256xf32>
    %c3_161 = arith.constant 3 : index
    %c0_162 = arith.constant 0 : index
    %c0_163 = arith.constant 0 : index
    %384 = vector.load %arg6[%c3_161, %c0_162, %c0_163] : memref<8x2x256xf32, #tpu.memory_space<vmem>>, vector<1x2x256xf32>
    %385 = vector.shape_cast %384 : vector<1x2x256xf32> to vector<2x256xf32>
    %386 = vector.shape_cast %383 : vector<2x256xf32> to vector<1x2x256xf32>
    tpu.vector_store %arg6[%c3_161, %c0_162, %c0_163], %386 {strides = array<i32>} : memref<8x2x256xf32, #tpu.memory_space<vmem>>, vector<1x2x256xf32>,
    %c16_164 = arith.constant 16 : index
    %387 = memref.load %arg3[%c16_164] : memref<32xf32, #tpu.memory_space<smem>>
    %388 = vector.broadcast %387 : f32 to vector<2x256xf32>
    %389 = arith.mulf %80, %388 : vector<2x256xf32>
    %c17_165 = arith.constant 17 : index
    %390 = memref.load %arg3[%c17_165] : memref<32xf32, #tpu.memory_space<smem>>
    %391 = vector.broadcast %390 : f32 to vector<2x256xf32>
    %392 = arith.mulf %158, %391 : vector<2x256xf32>
    %393 = arith.addf %389, %392 : vector<2x256xf32>
    %c18_166 = arith.constant 18 : index
    %394 = memref.load %arg3[%c18_166] : memref<32xf32, #tpu.memory_space<smem>>
    %395 = vector.broadcast %394 : f32 to vector<2x256xf32>
    %396 = arith.mulf %236, %395 : vector<2x256xf32>
    %397 = arith.addf %393, %396 : vector<2x256xf32>
    %c19_167 = arith.constant 19 : index
    %398 = memref.load %arg3[%c19_167] : memref<32xf32, #tpu.memory_space<smem>>
    %399 = vector.broadcast %398 : f32 to vector<2x256xf32>
    %400 = arith.mulf %314, %399 : vector<2x256xf32>
    %401 = arith.addf %397, %400 : vector<2x256xf32>
    %c4_168 = arith.constant 4 : index
    %c0_169 = arith.constant 0 : index
    %c0_170 = arith.constant 0 : index
    %402 = vector.load %arg6[%c4_168, %c0_169, %c0_170] : memref<8x2x256xf32, #tpu.memory_space<vmem>>, vector<1x2x256xf32>
    %403 = vector.shape_cast %402 : vector<1x2x256xf32> to vector<2x256xf32>
    %404 = vector.shape_cast %401 : vector<2x256xf32> to vector<1x2x256xf32>
    tpu.vector_store %arg6[%c4_168, %c0_169, %c0_170], %404 {strides = array<i32>} : memref<8x2x256xf32, #tpu.memory_space<vmem>>, vector<1x2x256xf32>,
    %c20_171 = arith.constant 20 : index
    %405 = memref.load %arg3[%c20_171] : memref<32xf32, #tpu.memory_space<smem>>
    %406 = vector.broadcast %405 : f32 to vector<2x256xf32>
    %407 = arith.mulf %80, %406 : vector<2x256xf32>
    %c21_172 = arith.constant 21 : index
    %408 = memref.load %arg3[%c21_172] : memref<32xf32, #tpu.memory_space<smem>>
    %409 = vector.broadcast %408 : f32 to vector<2x256xf32>
    %410 = arith.mulf %158, %409 : vector<2x256xf32>
    %411 = arith.addf %407, %410 : vector<2x256xf32>
    %c22_173 = arith.constant 22 : index
    %412 = memref.load %arg3[%c22_173] : memref<32xf32, #tpu.memory_space<smem>>
    %413 = vector.broadcast %412 : f32 to vector<2x256xf32>
    %414 = arith.mulf %236, %413 : vector<2x256xf32>
    %415 = arith.addf %411, %414 : vector<2x256xf32>
    %c23_174 = arith.constant 23 : index
    %416 = memref.load %arg3[%c23_174] : memref<32xf32, #tpu.memory_space<smem>>
    %417 = vector.broadcast %416 : f32 to vector<2x256xf32>
    %418 = arith.mulf %314, %417 : vector<2x256xf32>
    %419 = arith.addf %415, %418 : vector<2x256xf32>
    %c5_175 = arith.constant 5 : index
    %c0_176 = arith.constant 0 : index
    %c0_177 = arith.constant 0 : index
    %420 = vector.load %arg6[%c5_175, %c0_176, %c0_177] : memref<8x2x256xf32, #tpu.memory_space<vmem>>, vector<1x2x256xf32>
    %421 = vector.shape_cast %420 : vector<1x2x256xf32> to vector<2x256xf32>
    %422 = vector.shape_cast %419 : vector<2x256xf32> to vector<1x2x256xf32>
    tpu.vector_store %arg6[%c5_175, %c0_176, %c0_177], %422 {strides = array<i32>} : memref<8x2x256xf32, #tpu.memory_space<vmem>>, vector<1x2x256xf32>,
    %c24_178 = arith.constant 24 : index
    %423 = memref.load %arg3[%c24_178] : memref<32xf32, #tpu.memory_space<smem>>
    %424 = vector.broadcast %423 : f32 to vector<2x256xf32>
    %425 = arith.mulf %80, %424 : vector<2x256xf32>
    %c25_179 = arith.constant 25 : index
    %426 = memref.load %arg3[%c25_179] : memref<32xf32, #tpu.memory_space<smem>>
    %427 = vector.broadcast %426 : f32 to vector<2x256xf32>
    %428 = arith.mulf %158, %427 : vector<2x256xf32>
    %429 = arith.addf %425, %428 : vector<2x256xf32>
    %c26_180 = arith.constant 26 : index
    %430 = memref.load %arg3[%c26_180] : memref<32xf32, #tpu.memory_space<smem>>
    %431 = vector.broadcast %430 : f32 to vector<2x256xf32>
    %432 = arith.mulf %236, %431 : vector<2x256xf32>
    %433 = arith.addf %429, %432 : vector<2x256xf32>
    %c27_181 = arith.constant 27 : index
    %434 = memref.load %arg3[%c27_181] : memref<32xf32, #tpu.memory_space<smem>>
    %435 = vector.broadcast %434 : f32 to vector<2x256xf32>
    %436 = arith.mulf %314, %435 : vector<2x256xf32>
    %437 = arith.addf %433, %436 : vector<2x256xf32>
    %c6_182 = arith.constant 6 : index
    %c0_183 = arith.constant 0 : index
    %c0_184 = arith.constant 0 : index
    %438 = vector.load %arg6[%c6_182, %c0_183, %c0_184] : memref<8x2x256xf32, #tpu.memory_space<vmem>>, vector<1x2x256xf32>
    %439 = vector.shape_cast %438 : vector<1x2x256xf32> to vector<2x256xf32>
    %440 = vector.shape_cast %437 : vector<2x256xf32> to vector<1x2x256xf32>
    tpu.vector_store %arg6[%c6_182, %c0_183, %c0_184], %440 {strides = array<i32>} : memref<8x2x256xf32, #tpu.memory_space<vmem>>, vector<1x2x256xf32>,
    %c28_185 = arith.constant 28 : index
    %441 = memref.load %arg3[%c28_185] : memref<32xf32, #tpu.memory_space<smem>>
    %442 = vector.broadcast %441 : f32 to vector<2x256xf32>
    %443 = arith.mulf %80, %442 : vector<2x256xf32>
    %c29_186 = arith.constant 29 : index
    %444 = memref.load %arg3[%c29_186] : memref<32xf32, #tpu.memory_space<smem>>
    %445 = vector.broadcast %444 : f32 to vector<2x256xf32>
    %446 = arith.mulf %158, %445 : vector<2x256xf32>
    %447 = arith.addf %443, %446 : vector<2x256xf32>
    %c30_187 = arith.constant 30 : index
    %448 = memref.load %arg3[%c30_187] : memref<32xf32, #tpu.memory_space<smem>>
    %449 = vector.broadcast %448 : f32 to vector<2x256xf32>
    %450 = arith.mulf %236, %449 : vector<2x256xf32>
    %451 = arith.addf %447, %450 : vector<2x256xf32>
    %c31_188 = arith.constant 31 : index
    %452 = memref.load %arg3[%c31_188] : memref<32xf32, #tpu.memory_space<smem>>
    %453 = vector.broadcast %452 : f32 to vector<2x256xf32>
    %454 = arith.mulf %314, %453 : vector<2x256xf32>
    %455 = arith.addf %451, %454 : vector<2x256xf32>
    %c7_189 = arith.constant 7 : index
    %c0_190 = arith.constant 0 : index
    %c0_191 = arith.constant 0 : index
    %456 = vector.load %arg6[%c7_189, %c0_190, %c0_191] : memref<8x2x256xf32, #tpu.memory_space<vmem>>, vector<1x2x256xf32>
    %457 = vector.shape_cast %456 : vector<1x2x256xf32> to vector<2x256xf32>
    %458 = vector.shape_cast %455 : vector<2x256xf32> to vector<1x2x256xf32>
    tpu.vector_store %arg6[%c7_189, %c0_190, %c0_191], %458 {strides = array<i32>} : memref<8x2x256xf32, #tpu.memory_space<vmem>>, vector<1x2x256xf32>,
    return
  }
  func.func @transform_0(%arg0: i32) -> (i32, i32, i32) {
    %c0_i32 = arith.constant 0 : i32
    %c0_i32_0 = arith.constant 0 : i32
    %c0_i32_1 = arith.constant 0 : i32
    return %c0_i32, %arg0, %c0_i32_0 : i32, i32, i32
  }
  func.func @transform_1(%arg0: i32) -> i32 {
    %c0_i32 = arith.constant 0 : i32
    %c0_i32_0 = arith.constant 0 : i32
    return %c0_i32 : i32
  }
  func.func @transform_2(%arg0: i32) -> i32 {
    %c0_i32 = arith.constant 0 : i32
    %c0_i32_0 = arith.constant 0 : i32
    return %c0_i32 : i32
  }
  func.func @transform_3(%arg0: i32) -> i32 {
    %c0_i32 = arith.constant 0 : i32
    %c0_i32_0 = arith.constant 0 : i32
    return %c0_i32 : i32
  }
  func.func @transform_4(%arg0: i32) -> (i32, i32) {
    %c0_i32 = arith.constant 0 : i32
    %c0_i32_0 = arith.constant 0 : i32
    %c0_i32_1 = arith.constant 0 : i32
    return %c0_i32, %c0_i32_0 : i32, i32
  }
  func.func @transform_5(%arg0: i32) -> (i32, i32, i32) {
    %c0_i32 = arith.constant 0 : i32
    %c0_i32_0 = arith.constant 0 : i32
    %c0_i32_1 = arith.constant 0 : i32
    return %c0_i32, %arg0, %c0_i32_0 : i32, i32, i32
  }
}

</mosaic_0001>

<bundles_post_ra>
// kernel: tpu_custom_call.1
= control target key start
LH: loop header
LB: loop body
LE: loop exit
PB: predicated region body
PF: predicated region fallthrough
CT: control target
= control target key end

     0   :  { %11 = vsyncpa [#allocation4], 0  ;;  %s1366_s0 = inlined_call_operand.hbm [shape: f32[4,2,290], index: 0, kind: input, shape index: {}]   ;;  %s1367_s1 = inlined_call_operand.vmem [shape: f32[36], index: 1, kind: input, shape index: {}]   ;;  %s1368_s2 = inlined_call_operand.vmem [shape: f32[32], index: 2, kind: input, shape index: {}]   ;;  %s1369_s3 = inlined_call_operand.<no memory space> [shape: f32[1], index: 3, kind: input, shape index: {}]   ;;  %s1370_s4 = inlined_call_operand.hbm [shape: f32[3,256], index: 4, kind: input, shape index: {}]   ;;  %s1371_s5 = inlined_call_operand.hbm [shape: f32[8,2,256], index: 5, kind: output, shape index: {}]  }
   0x1   :  { %12 = vsyncpa [#allocation6], 0 }
   0x2   :  { %13 = vsyncpa [#allocation9], 0 }
   0x3   :  { %14 = vsyncpa [#allocation11], 0 }
   0x4   :  { %15 = vsyncpa [#allocation5], 0  ;;  %s20_s20 = sshll.u32 %s1366_s0, 4  ;;  %s1018_s21 = smov [#allocation3]   ;;  %s21_s20 = int_to_ptr.hbm [resolvable:$true] %s20_s20 }
   0x5   :  { %s22_s22 = sshll.u32 %s1018_s21, 4  ;;  %s34_s25 = sshll.u32 %s1367_s1, 4  ;;  %s23_s22 = int_to_ptr.vmem [resolvable:$true] %s22_s22  ;;  %s35_s25 = int_to_ptr.vmem [resolvable:$true] %s34_s25 }
   0x6   :  { %s1019_s26 = smov 96   ;;  %s1020_s27 = smov 6  }
   0x7   :  { %28 = dma.hbm_to_vmem [thread:$0]  %s21_s20, 384, %s23_s22, [#allocation4], %s1019_s26, %s1019_s26, %s1020_s27  }
   0x8   :  { %s1021_s28 = smov [#allocation7]   ;;  %s43_s0 = sshll.u32 %s1368_s2, 4  ;;  %s44_s0 = int_to_ptr.vmem [resolvable:$true] %s43_s0 }
   0x9   :  { %37 = dma.vmem_to_smem %s35_s25, 16, %s1021_s28, [#allocation6]  }
   0xa   :  { %s54_s8 = sshll.u32 %s1370_s4, 4  ;;  %s1022_s9 = smov [#allocation8]   ;;  %s55_s8 = int_to_ptr.hbm [resolvable:$true] %s54_s8 }
   0xb   :  { %46 = dma.vmem_to_smem %s44_s0, 16, %s1022_s9, [#allocation9]  }
   0xc   :  { %s1023_s1 = smov [#allocation10]  }
   0xd   :  { %s56_s10 = sshll.u32 %s1023_s1, 4  ;;  %s57_s10 = int_to_ptr.vmem [resolvable:$true] %s56_s10 }
   0xe   :  { %59 = dma.hbm_to_vmem [thread:$0]  %s55_s8, 128, %s57_s10, [#allocation11]  }
   0xf   :  { %1008 = dma.done.wait [#allocation4], 384  }
  0x10   :  { %1009 = vsyncadd [#allocation4], 4294966912 }
  0x11   :  { %1010 = dma.done.wait [#allocation6], 16  }
  0x12   :  { %1011 = vsyncadd [#allocation6], 4294967280 }
  0x13   :  { %1012 = dma.done.wait [#allocation9], 16  }
  0x14   :  { %1013 = vsyncadd [#allocation9], 4294967280 }
  0x15   :  { %1014 = dma.done.wait [#allocation11], 128  }
  0x16   :  { %1015 = vsyncadd [#allocation11], 4294967168 }
  0x17   :  { %76 = sfence }
  0x18   :  { %s828_s2 = sld [smem:[#allocation7 + $0x7]]  ;;  %v80_v0 = vld [vmem:[#allocation10 + $0x2] ss:$4 sm:$0x3]  ;;  %vm112_vm0 = vcmask 1041408   ;;  %s1024_s13 = smov 2  }
  0x19   :  { %s827_s11 = sld [smem:[#allocation7 + $0x4]]  ;;  %v171_v1 = vperm.slane %v80_v0, 0  ;;  %v172_v2 = vperm.slane %v80_v0, 1  ;;  %v86_v3 = vld [vmem:[#allocation3] sm:$0x3f]  ;;  %s1025_s14 = smov 112  }
  0x1a   :  { %s830_s4 = sld [smem:[#allocation7 + $0x5]]  ;;  %v1082_v16 = vld [vmem:[#allocation3 + $0x6] sm:$0x3f]  ;;  %vm93_vm1 = vcmask 916480   ;;  %vm104_vm2 = vcmask 785408   ;;  %s1026_s22 = smov 127  }
  0x1b   :  { %s831_s12 = sld [smem:[#allocation7 + $0x8]]  ;;  %v173_v4 = vrot.slane %v172_v2, 6  ;;  %vm178_vm3 = vcmask 15360   ;;  %s1027_s24 = smov 126   ;;  %v82_v59 = vld [vmem:[#allocation3] sm:$0xf] }
  0x1c   :  { %s825_s15 = sld [smem:[#allocation7 + $0x6]]  ;;  %v78_v0 = vld [vmem:[#allocation10] ss:$4 sm:$0x3]  ;;  %vm143_vm4 = vcmask 1039360   ;;  %vm186_vm5 = vcmask 1031168  }
  0x1d   :  { %v174_v6 = vsel %vm112_vm0, %v171_v1, %v173_v4  ;;  %s836_s16 = sld [smem:[#allocation7 + $0xd]] }
  0x1e   :  { %v130_v5 = vstv %s828_s2  ;;  %175 = vrot.lane.b32.xlu2 %v174_v6, %s1024_s13  ;;  %s840_s17 = sld [smem:[#allocation7 + $0x11]] }
  0x1f   :  { %v131_v7 = vmul.f32 %v130_v5, %v86_v3  ;;  %v120_v8 = vstv %s827_s11  ;;  %s824_s18 = sld [smem:[#allocation7 + $0x3]]  ;;  %v110_v5 = vperm.slane %v78_v0, 1 }
  0x20   :  { %v121_v9 = vmul.f32 %v120_v8, %v86_v3  ;;  %v151_v11 = vstv %s830_s4  ;;  %s826_s19 = sld [smem:[#allocation7 + $0x1]] }
  0x21   :  { %133 = vrot.lane.b32.xlu1 %v131_v7, %s1019_s26  ;;  %v161_v10 = vstv %s831_s12  ;;  %v152_v13 = vmul.f32 %v151_v11, %v86_v3  ;;  %s829_s20 = sld [smem:[#allocation7 + $0x2]]  ;;  %v109_v11 = vperm.slane %v78_v0, 0 }
  0x22   :  { %123 = vrot.lane.b32.xlu0 %v121_v9, %s1025_s14  ;;  %v162_v12 = vmul.f32 %v161_v10, %v86_v3  ;;  %v98_v14 = vstv %s825_s15  ;;  %s839_s21 = sld [smem:[#allocation7 + $0xe]] }
  0x23   :  { %v99_v15 = vmul.f32 %v98_v14, %v86_v3  ;;  %v275_v17 = vstv %s836_s16  ;;  %s837_s23 = sld [smem:[#allocation7 + $0x10]] }
  0x24   :  { %v276_v18 = vmul.f32 %v275_v17, %v1082_v16  ;;  %v315_v19 = vstv %s840_s17  ;;  %s834_s25 = sld [smem:[#allocation7 + $0xf]] }
  0x25   :  { %v316_v20 = vmul.f32 %v315_v19, %v1082_v16  ;;  %v87_v21 = vstv %s824_s18  ;;  %s833_s27 = sld [smem:[#allocation7 + $0xc]] }
  0x26   :  { %v88_v22 = vmul.f32 %v87_v21, %v86_v3  ;;  %v117_v23 = vstv %s826_s19  ;;  %s81_s28 = sld [smem:[#allocation7]] }
  0x27   :  { %v118_v26 = vmul.f32 %v117_v23, %v86_v3  ;;  %v148_v32 = vstv %s829_s20  ;;  %s835_s29 = sld [smem:[#allocation7 + $0xa]] }
  0x28   :  { %90 = vrot.lane.b32.xlu2 %v88_v22, %s1025_s14  ;;  %v149_v36 = vmul.f32 %v148_v32, %v86_v3  ;;  %v305_v39 = vstv %s839_s21  ;;  %s845_s30 = sld [smem:[#allocation7 + $0x16]] }
  0x29   :  { %164 = vrot.lane.b32.xlu1 %v162_v12, %s1019_s26  ;;  %v306_v44 = vmul.f32 %v305_v39, %v1082_v16  ;;  %v285_v49 = vstv %s837_s23  ;;  %v111_v12 = vrot.slane %v110_v5, 6  ;;  %s838_s0 = sld [smem:[#allocation7 + $0xb]]  ;;  %v246_v5 = vld [vmem:[#allocation3 + $0x6] sm:$0xf] }
  0x2a   :  { %154 = vrot.lane.b32.xlu0 %v152_v13, %s1025_s14  ;;  %v286_v50 = vmul.f32 %v285_v49, %v1082_v16  ;;  %v261_v51 = vstv %s834_s25  ;;  %s846_s6 = sld [smem:[#allocation7 + $0x19]] }
  0x2b   :  { %v262_v52 = vmul.f32 %v261_v51, %v1082_v16  ;;  %v251_v55 = vstv %s833_s27  ;;  %s848_s7 = sld [smem:[#allocation7 + $0x17]] }
  0x2c   :  { %v252_v56 = vmul.f32 %v251_v55, %v1082_v16  ;;  %v83_v60 = vstv %s81_s28  ;;  %s849_s8 = sld [smem:[#allocation7 + $0x1a]] }
  0x2d   :  { %v272_v62 = vstv %s835_s29  ;;  %v84_v1 = vmul.f32 %v83_v60, %v82_v59  ;;  %s844_s9 = sld [smem:[#allocation7 + $0x13]] }
  0x2e   :  { %v273_v2 = vmul.f32 %v272_v62, %v1082_v16  ;;  %v416_v23 = vstv %s845_s30  ;;  %s842_s1 = sld [smem:[#allocation7 + $0x15]] }
  0x2f   :  { %s843_s10 = sld [smem:[#allocation7 + $0x18]] }
  0x30   :  { %s832_s2 = sld [smem:[#allocation7 + $0x9]] }
  0x31   :  { %s857_s11 = sld [smem:[#allocation7 + $0x20]] }
  0x32   :  { %101 = vrot.lane.b32.xlu0 %v99_v15, %s1019_s26  ;;  %s847_s4 = sld [smem:[#allocation7 + $0x14]] }
  0x33   :  { %v413_v55 = vstv %s844_s9  ;;  %s854_s12 = sld [smem:[#allocation7 + $0x1f]] }
  0x34   :  { %s855_s13 = sld [smem:[#allocation7 + $0x22]] }
  0x35   :  { %s858_s15 = sld [smem:[#allocation7 + $0x23]] }
  0x36   :  { %s851_s16 = sld [smem:[#allocation7 + $0x1e]] }
  0x37   :  { %s852_s17 = sld [smem:[#allocation7 + $0x21]] }
  0x38   :  { %s841_s18 = sld [smem:[#allocation7 + $0x12]] }
  0x39   :  { %s856_s19 = sld [smem:[#allocation7 + $0x1d]] }
  0x3a   :  { %278 = vrot.lane.b32.xlu0 %v276_v18, %s1025_s14  ;;  %v1112_v18 = vsel %vm112_vm0, %v109_v11, %v111_v12  ;;  %s853_s20 = sld [smem:[#allocation7 + $0x1c]] }
  0x3b   :  { %s1236_s21 = sld [smem:[#allocation8 + $0x5]] }
  0x3c   :  { %s1240_s23 = sld [smem:[#allocation8 + $0xd]] }
  0x3d   :  { %s1245_s25 = sld [smem:[#allocation8 + $0x15]] }
  0x3e   :  { %s1247_s27 = sld [smem:[#allocation8 + $0x19]] }
  0x3f   :  { %s1249_s28 = sld [smem:[#allocation8 + $0x1d]] }
  0x40   :  { %s1252_s29 = sld [smem:[#allocation8]] }
  0x41   :  { %s1254_s30 = sld [smem:[#allocation8 + $0x4]] }
  0x42   :  { %318 = vrot.lane.b32.xlu0 %v316_v20, %s1019_s26  ;;  %s1264_s9 = sld [smem:[#allocation8 + $0x18]] }
  0x4a   :  { %264 = vrot.lane.b32.xlu0 %v262_v52, %s1019_s26 }
  0x78   :  { %v176_v34 = vpop.permute.xlu2 %175 }
  0x79   :  { %v177_v41 = vrot.slane %v176_v34, 6 }
  0x7b   :  { %v1095_v46 = vsel %vm178_vm3, %v177_v41, %v176_v34 }
  0x82   :  { %v91_v53 = vpop.permute.xlu2 %90 }
  0x83   :  { %v92_v61 = vrot.slane %v91_v53, 2 }
  0x85   :  { %v94_v3 = vsel %vm93_vm1, %v91_v53, %v92_v61 }
  0x86   :  { %v96_v7 = vadd.f32 %v94_v3, %v84_v1 }
  0x93   :  { %v134_v24 = vpop.permute.xlu1 %133 }
  0x94   :  { %v124_v25 = vpop.permute.xlu0 %123  ;;  %v135_v27 = vrot.slane %v134_v24, 2 }
  0x95   :  { %v125_v28 = vrot.slane %v124_v25, 2 }
  0x96   :  { %v136_v31 = vsel %vm104_vm2, %v134_v24, %v135_v27 }
  0x97   :  { %v126_v29 = vsel %vm93_vm1, %v124_v25, %v125_v28  ;;  %v1117_v25 = vld [vmem:[#allocation3 + $0xc] sm:$0x3f] }
  0x98   :  { %v128_v30 = vadd.f32 %v126_v29, %v118_v26  ;;  %v417_v28 = vmul.f32 %v416_v23, %v1117_v25 }
  0x9a   :  { %v138_v33 = vadd.f32 %v136_v31, %v128_v30  ;;  %v302_v30 = vstv %s838_s0  ;;  %s1256_s0 = sld [smem:[#allocation8 + $0x8]] }
  0x9b   :  { %v165_v35 = vpop.permute.xlu1 %164 }
  0x9c   :  { %140 = vrot.lane.b32.xlu1 %v138_v33, %s1026_s22  ;;  %v155_v37 = vpop.permute.xlu0 %154  ;;  %v166_v38 = vrot.slane %v165_v35, 2  ;;  %v303_v33 = vmul.f32 %v302_v30, %v1082_v16 }
  0x9d   :  { %v156_v40 = vrot.slane %v155_v37, 2 }
  0x9e   :  { %v167_v43 = vsel %vm104_vm2, %v165_v35, %v166_v38 }
  0x9f   :  { %v157_v42 = vsel %vm93_vm1, %v155_v37, %v156_v40 }
  0xa0   :  { %v159_v45 = vadd.f32 %v157_v42, %v149_v36  ;;  %v426_v36 = vstv %s846_s6  ;;  %s1258_s6 = sld [smem:[#allocation8 + $0xc]] }
  0xa1   :  { %v427_v40 = vmul.f32 %v426_v36, %v1117_v25 }
  0xa2   :  { %v169_v47 = vadd.f32 %v167_v43, %v159_v45 }
  0xa4   :  { %308 = vrot.lane.b32.xlu1 %v306_v44, %s1025_s14  ;;  %v181_v48 = vmul.f32 %v1095_v46, %v169_v47  ;;  %v102_v54 = vpop.permute.xlu0 %101 }
  0xa5   :  { %v103_v4 = vrot.slane %v102_v54, 2 }
  0xa6   :  { %183 = vrot.lane.b32.xlu2 %v181_v48, %s1027_s24  ;;  %v446_v48 = vstv %s848_s7  ;;  %s1260_s7 = sld [smem:[#allocation8 + $0x10]] }
  0xa7   :  { %v105_v10 = vsel %vm104_vm2, %v102_v54, %v103_v4  ;;  %v447_v49 = vmul.f32 %v446_v48, %v1117_v25  ;;  %v557_v48 = vstv %s854_s12  ;;  %s1282_s12 = sld [smem:[#allocation8 + $0x12]] }
  0xa8   :  { %v107_v15 = vadd.f32 %v105_v10, %v96_v7 }
  0xaa   :  { %v115_v22 = vmul.f32 %v1112_v18, %v107_v15  ;;  %v587_v15 = vstv %s857_s11  ;;  %s1274_s11 = sld [smem:[#allocation8 + $0xa]] }
  0xac   :  { %v279_v58 = vpop.permute.xlu0 %278 }
  0xad   :  { %v280_v63 = vrot.slane %v279_v58, 2 }
  0xae   :  { %288 = vrot.lane.b32.xlu2 %v286_v50, %s1019_s26  ;;  %v456_v50 = vstv %s849_s8  ;;  %s1262_s8 = sld [smem:[#allocation8 + $0x14]] }
  0xaf   :  { %v281_v6 = vsel %vm93_vm1, %v279_v58, %v280_v63  ;;  %v457_v51 = vmul.f32 %v456_v50, %v1117_v25  ;;  %v414_v58 = vmul.f32 %v413_v55, %v1117_v25  ;;  %v567_v55 = vstv %s855_s13  ;;  %s1285_s13 = sld [smem:[#allocation8 + $0x16]] }
  0xb0   :  { %v283_v8 = vadd.f32 %v281_v6, %v273_v2  ;;  %v402_v2 = vstv %s843_s10  ;;  %v247_v6 = vstv %s832_s2  ;;  %s1268_s10 = sld [smem:[#allocation8 + $0x2]] }
  0xb1   :  { %v403_v3 = vmul.f32 %v402_v2, %v1117_v25  ;;  %v248_v10 = vmul.f32 %v247_v6, %v246_v5  ;;  %v387_v2 = vld [vmem:[#allocation3 + $0xc] sm:$0xf]  ;;  %s1271_s2 = sld [smem:[#allocation8 + $0x6]] }
  0xb4   :  { %v319_v27 = vpop.permute.xlu0 %318 }
  0xb5   :  { %v320_v32 = vrot.slane %v319_v27, 2 }
  0xb6   :  { %254 = vrot.lane.b32.xlu2 %v252_v56, %s1025_s14 }
  0xb7   :  { %v321_v38 = vsel %vm104_vm2, %v319_v27, %v320_v32  ;;  %v443_v32 = vstv %s847_s4  ;;  %s1276_s4 = sld [smem:[#allocation8 + $0xe]] }
  0xbc   :  { %v265_v4 = vpop.permute.xlu0 %264 }
  0xbd   :  { %v266_v12 = vrot.slane %v265_v4, 2 }
  0xbf   :  { %v267_v23 = vsel %vm104_vm2, %v265_v4, %v266_v12 }
 0x100   :  { %v184_v57 = vpop.permute.xlu2 %183 }
 0x101   :  { %v185_v20 = vrot.slane %v184_v57, 2 }
 0x103   :  { %v187_v29 = vsel %vm186_vm5, %v184_v57, %v185_v20  ;;  %v392_v57 = vstv %s842_s1  ;;  %s1266_s1 = sld [smem:[#allocation8 + $0x1c]] }
 0x104   :  { %v393_v59 = vmul.f32 %v392_v57, %v1117_v25  ;;  %v597_v57 = vstv %s858_s15 }
 0x108   :  { %v289_v9 = vpop.permute.xlu2 %288 }
 0x109   :  { %v290_v13 = vrot.slane %v289_v9, 2 }
 0x10b   :  { %v291_v14 = vsel %vm104_vm2, %v289_v9, %v290_v13 }
 0x10c   :  { %v293_v17 = vadd.f32 %v291_v14, %v283_v8  ;;  %v1028_v8 = vmov 269488144   ;;  %v1147_v14 = vld [vmem:[#allocation3 + $0x12] sm:$0x3f] }
 0x10d   :  { %v204_v9 = vunpack.c.l.s4 %v1028_v8 }
 0x10e   :  { %v141_v19 = vpop.permute.xlu1 %140  ;;  %295 = vrot.lane.b32.xlu2 %v293_v17, %s1026_s22 }
 0x10f   :  { %v142_v21 = vrot.slane %v141_v19, 2  ;;  %v1149_v17 = vunpack.c.0.s8 %v204_v9 }
 0x110   :  { %v255_v52 = vpop.permute.xlu2 %254 }
 0x111   :  { %v144_v24 = vsel %vm143_vm4, %v141_v19, %v142_v21  ;;  %v256_v7 = vrot.slane %v255_v52, 2  ;;  %v588_v19 = vmul.f32 %v587_v15, %v1147_v14 }
 0x112   :  { %v146_v26 = vadd.f32 %v144_v24, %v115_v22 }
 0x113   :  { %v257_v11 = vsel %vm93_vm1, %v255_v52, %v256_v7 }
 0x114   :  { %v1121_v31 = vadd.f32 %v187_v29, %v146_v26  ;;  %v259_v21 = vadd.f32 %v257_v11, %v248_v10 }
 0x116   :  { %191 = vst [vmem:[#allocation1] ss:$4 sm:$0xff] %v1121_v31  ;;  %v309_v34 = vpop.permute.xlu1 %308  ;;  %419 = vrot.lane.b32.xlu2 %v417_v28, %s1025_s14  ;;  %v269_v26 = vadd.f32 %v267_v23, %v259_v21  ;;  %v554_v21 = vstv %s853_s20  ;;  %s1334_s20 = sld [smem:[#allocation8 + $0xb]] }
 0x117   :  { %v310_v35 = vrot.slane %v309_v34, 2 }
 0x119   :  { %v311_v37 = vsel %vm93_vm1, %v309_v34, %v310_v35  ;;  %v270_v35 = vmul.f32 %v269_v26, %v1112_v18 }
 0x11a   :  { %v313_v39 = vadd.f32 %v311_v37, %v303_v33  ;;  %v444_v37 = vmul.f32 %v443_v32, %v1117_v25 }
 0x11c   :  { %v323_v41 = vadd.f32 %v321_v38, %v313_v39 }
 0x11d   :  { %v192_v42 = vld.sshfl [vmem:[#allocation1] sm:$0xff pattern:$0x73625140]  ;;  %v193_v43 = vld.sshfl [vmem:[#allocation1 + $0x8] sm:$0xff pattern:$0x73625140] }
 0x11e   :  { %v324_v44 = vmul.f32 %v323_v41, %v1095_v46  ;;  %v196_v16 = vsel %vm112_vm0, %v192_v42, 0.0  ;;  %v197_v45 = vsel %vm112_vm0, %v193_v43, 0.0  ;;  %429 = vrot.lane.b32.xlu2 %v427_v40, %s1019_s26 }
 0x11f   :  { %v198_v47 = vadd.f32 %v197_v45, %v196_v16 }
 0x120   :  { %326 = vrot.lane.b32.xlu0 %v324_v44, %s1027_s24 }
 0x121   :  { %199 = vadd.xlane.f32.xlu1 %v198_v47 }
 0x128   :  { %449 = vrot.lane.b32.xlu0 %v447_v49, %s1025_s14 }
 0x130   :  { %459 = vrot.lane.b32.xlu0 %v457_v51, %s1019_s26 }
 0x138   :  { %395 = vrot.lane.b32.xlu0 %v393_v59, %s1025_s14  ;;  %v533_v59 = vstv %s851_s16 }
 0x13a   :  { %405 = vrot.lane.b32.xlu1 %v403_v3, %s1019_s26  ;;  %v388_v3 = vstv %s841_s18  ;;  %s1302_s18 = sld [smem:[#allocation8 + $0x1e]] }
 0x13b   :  { %v389_v6 = vmul.f32 %v388_v3, %v387_v2 }
 0x142   :  { %590 = vrot.lane.b32.xlu1 %v588_v19, %s1025_s14  ;;  %v584_v19 = vstv %s856_s19  ;;  %s1330_s19 = sld [smem:[#allocation8 + $0x7]] }
 0x168   :  { %v296_v53 = vpop.permute.xlu2 %295 }
 0x169   :  { %v297_v28 = vrot.slane %v296_v53, 2 }
 0x16b   :  { %v298_v36 = vsel %vm143_vm4, %v296_v53, %v297_v28  ;;  %v585_v28 = vmul.f32 %v584_v19, %v1147_v14 }
 0x16c   :  { %v300_v39 = vadd.f32 %v298_v36, %v270_v35 }
 0x170   :  { %v420_v54 = vpop.permute.xlu2 %419 }
 0x171   :  { %v421_v56 = vrot.slane %v420_v54, 2 }
 0x173   :  { %v422_v60 = vsel %vm93_vm1, %v420_v54, %v421_v56  ;;  %v558_v54 = vmul.f32 %v557_v48, %v1147_v14  ;;  %v568_v56 = vmul.f32 %v567_v55, %v1147_v14 }
 0x174   :  { %v424_v61 = vadd.f32 %v422_v60, %v414_v58  ;;  %v598_v58 = vmul.f32 %v597_v57, %v1147_v14  ;;  %v534_v60 = vmul.f32 %v533_v59, %v1147_v14 }
 0x178   :  { %v430_v62 = vpop.permute.xlu2 %429 }
 0x179   :  { %v431_v63 = vrot.slane %v430_v62, 2 }
 0x17b   :  { %v432_v0 = vsel %vm104_vm2, %v430_v62, %v431_v63 }
 0x17c   :  { %v434_v1 = vadd.f32 %v432_v0, %v424_v61  ;;  %v543_v61 = vstv %s852_s17  ;;  %s1294_s17 = sld [smem:[#allocation8 + $0x1a]] }
 0x17d   :  { %v544_v63 = vmul.f32 %v543_v61, %v1147_v14 }
 0x17e   :  { %436 = vrot.lane.b32.xlu0 %v434_v1, %s1026_s22 }
 0x192   :  { %v327_v13 = vpop.permute.xlu0 %326 }
 0x193   :  { %v328_v34 = vrot.slane %v327_v13, 2 }
 0x194   :  { %v200_v20 = vpop.xlane.xlu1 %199 }
 0x195   :  { %v201_v22 = vmul.f32 0.00390625, %v200_v20 }
 0x197   :  { %v206_v24 = vperm.slane %v201_v22, %v1149_v17 }
 0x199   :  { %v1156_v27 = vsub.f32 %v1121_v31, %v206_v24  ;;  %v329_v31 = vsel %vm186_vm5, %v327_v13, %v328_v34 }
 0x19a   :  { %v450_v29 = vpop.permute.xlu0 %449  ;;  %v331_v42 = vadd.f32 %v329_v31, %v300_v39 }
 0x19b   :  { %v209_v30 = vmul.f32 %v1156_v27, %v1156_v27  ;;  %v451_v33 = vrot.slane %v450_v29, 2 }
 0x19d   :  { %211 = vst [vmem:[#allocation1] ss:$4 sm:$0xff] %v209_v30  ;;  %v452_v38 = vsel %vm93_vm1, %v450_v29, %v451_v33  ;;  %v555_v30 = vmul.f32 %v554_v21, %v1147_v14 }
 0x19e   :  { %v454_v40 = vadd.f32 %v452_v38, %v444_v37 }
 0x1a2   :  { %v460_v41 = vpop.permute.xlu0 %459 }
 0x1a3   :  { %v461_v43 = vrot.slane %v460_v41, 2 }
 0x1a4   :  { %v1165_v44 = vld.sshfl [vmem:[#allocation1] sm:$0xff pattern:$0x73625140]  ;;  %v1167_v16 = vld.sshfl [vmem:[#allocation1 + $0x8] sm:$0xff pattern:$0x73625140] }
 0x1a5   :  { %333 = vst [vmem:[#allocation1] ss:$4 sm:$0xff] %v331_v42  ;;  %v462_v45 = vsel %vm104_vm2, %v460_v41, %v461_v43  ;;  %v217_v61 = vsel %vm112_vm0, %v1167_v16, 0.0 }
 0x1a6   :  { %v464_v47 = vadd.f32 %v462_v45, %v454_v40 }
 0x1a8   :  { %v465_v25 = vmul.f32 %v464_v47, %v1095_v46 }
 0x1aa   :  { %467 = vrot.lane.b32.xlu0 %v465_v25, %s1027_s24  ;;  %v396_v62 = vpop.permute.xlu0 %395 }
 0x1ab   :  { %v397_v4 = vrot.slane %v396_v62, 2 }
 0x1ac   :  { %v334_v49 = vld.sshfl [vmem:[#allocation1] sm:$0xff pattern:$0x73625140]  ;;  %v335_v50 = vld.sshfl [vmem:[#allocation1 + $0x8] sm:$0xff pattern:$0x73625140]  ;;  %v406_v1 = vpop.permute.xlu1 %405 }
 0x1ad   :  { %v338_v51 = vsel %vm112_vm0, %v334_v49, 0.0  ;;  %v339_v52 = vsel %vm112_vm0, %v335_v50, 0.0  ;;  %v398_v7 = vsel %vm93_vm1, %v396_v62, %v397_v4  ;;  %v407_v8 = vrot.slane %v406_v1, 2 }
 0x1ae   :  { %v340_v53 = vadd.f32 %v339_v52, %v338_v51  ;;  %v400_v10 = vadd.f32 %v398_v7, %v389_v6 }
 0x1af   :  { %v408_v11 = vsel %vm104_vm2, %v406_v1, %v407_v8  ;;  %v528_v1 = vld [vmem:[#allocation3 + $0x12] sm:$0xf] }
 0x1b0   :  { %341 = vadd.xlane.f32.xlu2 %v340_v53  ;;  %v410_v23 = vadd.f32 %v408_v11, %v400_v10 }
 0x1b2   :  { %560 = vrot.lane.b32.xlu0 %v558_v54, %s1025_s14  ;;  %v411_v34 = vmul.f32 %v410_v23, %v1112_v18 }
 0x1b4   :  { %v591_v9 = vpop.permute.xlu1 %590 }
 0x1b5   :  { %v592_v20 = vrot.slane %v591_v9, 2 }
 0x1b7   :  { %v593_v32 = vsel %vm93_vm1, %v591_v9, %v592_v20 }
 0x1b8   :  { %v595_v38 = vadd.f32 %v593_v32, %v585_v28 }
 0x1ba   :  { %570 = vrot.lane.b32.xlu0 %v568_v56, %s1019_s26 }
 0x1c2   :  { %536 = vrot.lane.b32.xlu0 %v534_v60, %s1025_s14  ;;  %v216_v60 = vsel %vm112_vm0, %v1165_v44, 0.0  ;;  %s1234_s14 = sld [smem:[#allocation8 + $0x1]] }
 0x1c3   :  { %v218_v62 = vadd.f32 %v217_v61, %v216_v60 }
 0x1c8   :  { %600 = vrot.lane.b32.xlu2 %v598_v58, %s1019_s26 }
 0x1ca   :  { %546 = vrot.lane.b32.xlu0 %v544_v63, %s1019_s26  ;;  %s850_s26 = sld [smem:[#allocation7 + $0x1b]] }
 0x1d0   :  { %v529_v2 = vstv %s850_s26  ;;  %s1340_s26 = sld [smem:[#allocation8 + $0xf]] }
 0x1d1   :  { %v530_v4 = vmul.f32 %v529_v2, %v528_v1 }
 0x1f0   :  { %v437_v0 = vpop.permute.xlu0 %436 }
 0x1f1   :  { %v438_v26 = vrot.slane %v437_v0, 2 }
 0x1f3   :  { %v439_v36 = vsel %vm143_vm4, %v437_v0, %v438_v26 }
 0x1f4   :  { %v441_v14 = vadd.f32 %v439_v36, %v411_v34 }
 0x21c   :  { %v468_v5 = vpop.permute.xlu0 %467 }
 0x21d   :  { %v469_v37 = vrot.slane %v468_v5, 2 }
 0x21f   :  { %v470_v45 = vsel %vm186_vm5, %v468_v5, %v469_v37 }
 0x220   :  { %v472_v50 = vadd.f32 %v470_v45, %v441_v14 }
 0x223   :  { %v342_v12 = vpop.xlane.xlu2 %341 }
 0x224   :  { %v343_v13 = vmul.f32 0.00390625, %v342_v12  ;;  %v561_v15 = vpop.permute.xlu0 %560 }
 0x225   :  { %v562_v22 = vrot.slane %v561_v15, 2 }
 0x226   :  { %v348_v24 = vperm.slane %v343_v13, %v1149_v17 }
 0x227   :  { %v563_v33 = vsel %vm93_vm1, %v561_v15, %v562_v22 }
 0x228   :  { %v1188_v29 = vsub.f32 %v331_v42, %v348_v24  ;;  %v565_v39 = vadd.f32 %v563_v33, %v555_v30 }
 0x22a   :  { %v351_v35 = vmul.f32 %v1188_v29, %v1188_v29 }
 0x22b   :  { %v601_v31 = vpop.permute.xlu2 %600 }
 0x22c   :  { %353 = vst [vmem:[#allocation1] ss:$4 sm:$0xff] %v351_v35  ;;  %v602_v40 = vrot.slane %v601_v31, 2  ;;  %v571_v41 = vpop.permute.xlu0 %570 }
 0x22d   :  { %v572_v42 = vrot.slane %v571_v41, 2 }
 0x22e   :  { %v603_v43 = vsel %vm104_vm2, %v601_v31, %v602_v40 }
 0x22f   :  { %v605_v47 = vadd.f32 %v603_v43, %v595_v38  ;;  %v573_v25 = vsel %vm104_vm2, %v571_v41, %v572_v42 }
 0x230   :  { %v575_v48 = vadd.f32 %v573_v25, %v565_v39 }
 0x231   :  { %v606_v49 = vmul.f32 %v605_v47, %v1095_v46 }
 0x232   :  { %577 = vrot.lane.b32.xlu0 %v575_v48, %s1026_s22  ;;  %s1238_s22 = sld [smem:[#allocation8 + $0x9]] }
 0x233   :  { %608 = vrot.lane.b32.xlu2 %v606_v49, %s1027_s24  ;;  %v354_v51 = vld.sshfl [vmem:[#allocation1] sm:$0xff pattern:$0x73625140]  ;;  %v355_v52 = vld.sshfl [vmem:[#allocation1 + $0x8] sm:$0xff pattern:$0x73625140] }
 0x234   :  { %474 = vst [vmem:[#allocation1] ss:$4 sm:$0xff] %v472_v50  ;;  %v358_v58 = vsel %vm112_vm0, %v354_v51, 0.0  ;;  %v359_v46 = vsel %vm112_vm0, %v355_v52, 0.0  ;;  %v537_v63 = vpop.permute.xlu0 %536  ;;  %s1243_s24 = sld [smem:[#allocation8 + $0x11]] }
 0x235   :  { %v360_v59 = vadd.f32 %v359_v46, %v358_v58  ;;  %v538_v3 = vrot.slane %v537_v63, 2 }
 0x237   :  { %v539_v5 = vsel %vm93_vm1, %v537_v63, %v538_v3 }
 0x238   :  { %v541_v7 = vadd.f32 %v539_v5, %v530_v4 }
 0x23b   :  { %v475_v53 = vld.sshfl [vmem:[#allocation1] sm:$0xff pattern:$0x73625140]  ;;  %v476_v54 = vld.sshfl [vmem:[#allocation1 + $0x8] sm:$0xff pattern:$0x73625140] }
 0x23c   :  { %v479_v55 = vsel %vm112_vm0, %v475_v53, 0.0  ;;  %v480_v56 = vsel %vm112_vm0, %v476_v54, 0.0  ;;  %v547_v0 = vpop.permute.xlu0 %546 }
 0x23d   :  { %v481_v57 = vadd.f32 %v480_v56, %v479_v55  ;;  %v548_v6 = vrot.slane %v547_v0, 2 }
 0x23f   :  { %482 = vadd.xlane.f32.xlu1 %v481_v57  ;;  %v549_v8 = vsel %vm104_vm2, %v547_v0, %v548_v6 }
 0x240   :  { %v551_v11 = vadd.f32 %v549_v8, %v541_v7 }
 0x242   :  { %v552_v19 = vmul.f32 %v551_v11, %v1112_v18 }
 0x247   :  { %361 = vadd.xlane.f32.xlu1 %v360_v59 }
 0x25c   :  { %219 = vadd.xlane.f32.xlu2 %v218_v62 }
 0x28d   :  { %v609_v15 = vpop.permute.xlu2 %608 }
 0x28e   :  { %v610_v22 = vrot.slane %v609_v15, 2 }
 0x290   :  { %v611_v24 = vsel %vm186_vm5, %v609_v15, %v610_v22 }
 0x2a4   :  { %v578_v44 = vpop.permute.xlu0 %577 }
 0x2a5   :  { %v579_v12 = vrot.slane %v578_v44, 2 }
 0x2a7   :  { %v580_v21 = vsel %vm143_vm4, %v578_v44, %v579_v12 }
 0x2a8   :  { %v582_v23 = vadd.f32 %v580_v21, %v552_v19  ;;  %v1291_v21 = vstv %s1369_s3  ;;  %s1324_s3 = sld [smem:[#allocation8 + $0x3]] }
 0x2aa   :  { %v613_v26 = vadd.f32 %v611_v24, %v582_v23  ;;  %v671_v23 = vstv %s1234_s14  ;;  %v687_v24 = vstv %s1236_s21  ;;  %s1342_s14 = sld [smem:[#allocation8 + $0x13]] }
 0x2ab   :  { %s1344_s21 = sld [smem:[#allocation8 + $0x17]] }
 0x2b2   :  { %v483_v9 = vpop.xlane.xlu1 %482 }
 0x2b3   :  { %v484_v10 = vmul.f32 0.00390625, %v483_v9 }
 0x2b5   :  { %v489_v16 = vperm.slane %v484_v10, %v1149_v17 }
 0x2b7   :  { %v1214_v13 = vsub.f32 %v472_v50, %v489_v16 }
 0x2b9   :  { %v492_v20 = vmul.f32 %v1214_v13, %v1214_v13 }
 0x2ba   :  { %v362_v48 = vpop.xlane.xlu1 %361 }
 0x2bb   :  { %494 = vst [vmem:[#allocation1] ss:$4 sm:$0xff] %v492_v20  ;;  %v363_v50 = vmul.f32 0.00390625, %v362_v48  ;;  %v675_v48 = vstv %s1268_s10 }
 0x2bd   :  { %v364_v52 = vadd.f32 1e-05, %v363_v50  ;;  %v708_v50 = vstv %s1274_s11 }
 0x2bf   :  { %904 = vrsqrt.f32 %v364_v52  ;;  %vm371_vm8 = vweird.f32 %v364_v52 }
 0x2c2   :  { %v495_v28 = vld.sshfl [vmem:[#allocation1] sm:$0xff pattern:$0x73625140]  ;;  %v496_v30 = vld.sshfl [vmem:[#allocation1 + $0x8] sm:$0xff pattern:$0x73625140] }
 0x2c3   :  { %v499_v32 = vsel %vm112_vm0, %v495_v28, 0.0  ;;  %v500_v33 = vsel %vm112_vm0, %v496_v30, 0.0  ;;  %615 = vst [vmem:[#allocation1] ss:$4 sm:$0xff] %v613_v26  ;;  %v704_v28 = vstv %s1238_s22  ;;  %v738_v30 = vstv %s1243_s24  ;;  %s1347_s22 = sld [smem:[#allocation8 + $0x1b]]  ;;  %s1029_s24 = smov [#allocation12]  }
 0x2c4   :  { %v501_v34 = vadd.f32 %v500_v33, %v499_v32  ;;  %v755_v32 = vstv %s1245_s25  ;;  %v772_v33 = vstv %s1247_s27  ;;  %s806_s25 = sshll.u32 %s1029_s24, 4  ;;  %s807_s25 = int_to_ptr.vmem [resolvable:$true] %s806_s25 }
 0x2c5   :  { %v905_v57 = vpop.eup %904 }
 0x2c6   :  { %502 = vadd.xlane.f32.xlu1 %v501_v34  ;;  %v366_v46 = vmul.f32 %v905_v57, %v364_v52  ;;  %vm372_vm6 = vweird.f32 %v905_v57  ;;  %v789_v34 = vstv %s1249_s28  ;;  %v725_v52 = vstv %s1276_s4 }
 0x2c7   :  { %vm373_vm9 = vmor %vm371_vm8, %vm372_vm6 }
 0x2c8   :  { %v367_v60 = vmul.f32 %v905_v57, %v366_v46 }
 0x2ca   :  { %v616_v18 = vld.sshfl [vmem:[#allocation1] sm:$0xff pattern:$0x73625140]  ;;  %v617_v35 = vld.sshfl [vmem:[#allocation1 + $0x8] sm:$0xff pattern:$0x73625140] }
 0x2cb   :  { %v620_v36 = vsel %vm112_vm0, %v616_v18, 0.0  ;;  %v621_v37 = vsel %vm112_vm0, %v617_v35, 0.0  ;;  %v368_v63 = vmul.f32 0.5, %v367_v60  ;;  %v668_v35 = vstv %s1252_s29  ;;  %s808_s29 = sshll.u32 %s1371_s5, 4  ;;  %s809_s29 = int_to_ptr.hbm [resolvable:$true] %s808_s29 }
 0x2cc   :  { %v622_v38 = vadd.f32 %v621_v37, %v620_v36  ;;  %v684_v36 = vstv %s1254_s30  ;;  %s1030_s30 = smov 64  }
 0x2cd   :  { %v369_v2 = vsub.f32 1.5, %v368_v63 }
 0x2ce   :  { %623 = vadd.xlane.f32.xlu0 %v622_v38 }
 0x2cf   :  { %v220_v49 = vpop.xlane.xlu2 %219  ;;  %v370_v5 = vmul.f32 %v905_v57, %v369_v2 }
 0x2d0   :  { %v221_v51 = vmul.f32 0.00390625, %v220_v49  ;;  %v691_v49 = vstv %s1271_s2 }
 0x2d1   :  { %v374_v8 = vsel %vm373_vm9, %v905_v57, %v370_v5  ;;  %v776_v57 = vstv %s1294_s17 }
 0x2d2   :  { %v222_v53 = vadd.f32 1e-05, %v221_v51  ;;  %v379_v11 = vperm.slane %v374_v8, %v1149_v17 }
 0x2d4   :  { %906 = vrsqrt.f32 %v222_v53  ;;  %vm229_vm10 = vweird.f32 %v222_v53  ;;  %v381_v20 = vmul.f32 %v379_v11, %v1188_v29 }
 0x2d6   :  { %v383_v18 = vmul.f32 %v381_v20, %v1291_v21  ;;  %vm382_vm15 = vcmp.gt.f32.partialorder %v381_v20, 0.0 }
 0x2da   :  { %v907_v58 = vpop.eup %906 }
 0x2db   :  { %v224_v59 = vmul.f32 %v907_v58, %v222_v53  ;;  %vm230_vm7 = vweird.f32 %v907_v58 }
 0x2dc   :  { %vm231_vm11 = vmor %vm229_vm10, %vm230_vm7 }
 0x2dd   :  { %v225_v61 = vmul.f32 %v907_v58, %v224_v59 }
 0x2df   :  { %v226_v0 = vmul.f32 0.5, %v225_v61 }
 0x2e1   :  { %v227_v3 = vsub.f32 1.5, %v226_v0 }
 0x2e3   :  { %v228_v6 = vmul.f32 %v907_v58, %v227_v3 }
 0x2e5   :  { %v232_v9 = vsel %vm231_vm11, %v907_v58, %v228_v6  ;;  %v793_v58 = vstv %s1302_s18 }
 0x2e6   :  { %v237_v12 = vperm.slane %v232_v9, %v1149_v17 }
 0x2e8   :  { %v239_v22 = vmul.f32 %v237_v12, %v1156_v27  ;;  %v721_v27 = vstv %s1240_s23  ;;  %s1349_s23 = sld [smem:[#allocation8 + $0x1f]] }
 0x2ea   :  { %v242_v37 = vmul.f32 %v1291_v21, %v239_v22 }
 0x339   :  { %v503_v54 = vpop.xlane.xlu1 %502 }
 0x33a   :  { %v504_v55 = vmul.f32 0.00390625, %v503_v54 }
 0x33c   :  { %v505_v56 = vadd.f32 1e-05, %v504_v55  ;;  %v742_v55 = vstv %s1282_s12 }
 0x33e   :  { %908 = vrsqrt.f32 %v505_v56  ;;  %vm512_vm13 = vweird.f32 %v505_v56 }
 0x341   :  { %v624_v31 = vpop.xlane.xlu0 %623 }
 0x342   :  { %v625_v39 = vmul.f32 0.00390625, %v624_v31 }
 0x344   :  { %v630_v40 = vperm.slane %v625_v39, %v1149_v17  ;;  %v1232_v62 = vpop.eup %908  ;;  %v701_v39 = vstv %s1256_s0  ;;  %s1031_s0 = smov 4  }
 0x345   :  { %v507_v1 = vmul.f32 %v1232_v62, %v505_v56  ;;  %vm513_vm12 = vweird.f32 %v1232_v62  ;;  %v759_v56 = vstv %s1285_s13 }
 0x346   :  { %v1226_v41 = vsub.f32 %v613_v26, %v630_v40  ;;  %vm1296_vm14 = vmor %vm512_vm13, %vm513_vm12  ;;  %v718_v40 = vstv %s1258_s6 }
 0x347   :  { %v508_v4 = vmul.f32 %v1232_v62, %v507_v1 }
 0x348   :  { %v633_v42 = vmul.f32 %v1226_v41, %v1226_v41 }
 0x349   :  { %v509_v7 = vmul.f32 0.5, %v508_v4 }
 0x34a   :  { %635 = vst [vmem:[#allocation1] ss:$4 sm:$0xff] %v633_v42  ;;  %v735_v42 = vstv %s1260_s7 }
 0x34b   :  { %v510_v44 = vsub.f32 1.5, %v509_v7 }
 0x34d   :  { %v511_v15 = vmul.f32 %v1232_v62, %v510_v44 }
 0x34f   :  { %v515_v26 = vsel %vm1296_vm14, %v1232_v62, %v511_v15 }
 0x350   :  { %v520_v38 = vperm.slane %v515_v26, %v1149_v17 }
 0x351   :  { %v636_v14 = vld.sshfl [vmem:[#allocation1] sm:$0xff pattern:$0x73625140]  ;;  %v637_v43 = vld.sshfl [vmem:[#allocation1 + $0x8] sm:$0xff pattern:$0x73625140] }
 0x352   :  { %v640_v45 = vsel %vm112_vm0, %v636_v14, 0.0  ;;  %v641_v47 = vsel %vm112_vm0, %v637_v43, 0.0  ;;  %vm240_vm0 = vcmp.gt.f32.partialorder %v239_v22, 0.0  ;;  %v752_v14 = vstv %s1262_s8 }
 0x353   :  { %v642_v25 = vadd.f32 %v641_v47, %v640_v45  ;;  %v769_v43 = vstv %s1264_s9  ;;  %v786_v45 = vstv %s1266_s1  ;;  %v243_v51 = vsel %vm240_vm0, %v239_v22, %v242_v37 }
 0x354   :  { %v522_v53 = vmul.f32 %v520_v38, %v1214_v13  ;;  %v669_v0 = vmul.f32 %v668_v35, %v243_v51  ;;  %v685_v1 = vmul.f32 %v684_v36, %v243_v51  ;;  %v702_v13 = vmul.f32 %v701_v39, %v243_v51 }
 0x355   :  { %643 = vadd.xlane.f32.xlu1 %v642_v25  ;;  %v384_v25 = vsel %vm382_vm15, %v381_v20, %v383_v18  ;;  %v719_v4 = vmul.f32 %v718_v40, %v243_v51  ;;  %v736_v5 = vmul.f32 %v735_v42, %v243_v51  ;;  %v753_v6 = vmul.f32 %v752_v14, %v243_v51 }
 0x356   :  { %v672_v46 = vmul.f32 %v671_v23, %v384_v25  ;;  %v688_v59 = vmul.f32 %v687_v24, %v384_v25  ;;  %v705_v60 = vmul.f32 %v704_v28, %v384_v25  ;;  %v722_v62 = vmul.f32 %v721_v27, %v384_v25 }
 0x357   :  { %v739_v63 = vmul.f32 %v738_v30, %v384_v25  ;;  %v524_v2 = vmul.f32 %v522_v53, %v1291_v21  ;;  %vm523_vm2 = vcmp.gt.f32.partialorder %v522_v53, 0.0  ;;  %v756_v7 = vmul.f32 %v755_v32, %v384_v25 }
 0x358   :  { %v770_v8 = vmul.f32 %v769_v43, %v243_v51  ;;  %v773_v44 = vmul.f32 %v772_v33, %v384_v25  ;;  %v673_v11 = vadd.f32 %v672_v46, %v669_v0  ;;  %v689_v12 = vadd.f32 %v688_v59, %v685_v1 }
 0x359   :  { %v706_v15 = vadd.f32 %v705_v60, %v702_v13  ;;  %v525_v20 = vsel %vm523_vm2, %v522_v53, %v524_v2  ;;  %v723_v29 = vadd.f32 %v722_v62, %v719_v4  ;;  %v740_v23 = vadd.f32 %v739_v63, %v736_v5 }
 0x35a   :  { %v757_v24 = vadd.f32 %v756_v7, %v753_v6  ;;  %v774_v26 = vadd.f32 %v773_v44, %v770_v8  ;;  %v679_v28 = vstv %s1324_s3  ;;  %v695_v27 = vstv %s1330_s19 }
 0x35b   :  { %v712_v30 = vstv %s1334_s20  ;;  %v676_v32 = vmul.f32 %v675_v48, %v525_v20  ;;  %v692_v33 = vmul.f32 %v691_v49, %v525_v20  ;;  %v729_v35 = vstv %s1340_s26 }
 0x35c   :  { %v746_v36 = vstv %s1342_s14  ;;  %v763_v37 = vstv %s1344_s21  ;;  %v780_v38 = vstv %s1347_s22  ;;  %v743_v39 = vmul.f32 %v742_v55, %v525_v20 }
 0x35d   :  { %v777_v42 = vmul.f32 %v776_v57, %v525_v20  ;;  %v794_v14 = vmul.f32 %v793_v58, %v525_v20  ;;  %v797_v43 = vstv %s1349_s23 }
 0x35f   :  { %v778_v62 = vadd.f32 %v777_v42, %v774_v26 }
 0x3c8   :  { %v644_v10 = vpop.xlane.xlu1 %643 }
 0x3c9   :  { %v645_v16 = vmul.f32 0.00390625, %v644_v10  ;;  %v790_v10 = vmul.f32 %v789_v34, %v384_v25  ;;  %v709_v34 = vmul.f32 %v708_v50, %v525_v20 }
 0x3cb   :  { %v1280_v19 = vadd.f32 1e-05, %v645_v16  ;;  %v787_v16 = vmul.f32 %v786_v45, %v243_v51  ;;  %v677_v45 = vadd.f32 %v676_v32, %v673_v11  ;;  %v710_v25 = vadd.f32 %v709_v34, %v706_v15 }
 0x3cd   :  { %910 = vrsqrt.f32 %v1280_v19  ;;  %vm653_vm3 = vweird.f32 %v1280_v19 }
 0x3d3   :  { %v911_v31 = vpop.eup %910 }
 0x3d4   :  { %v648_v47 = vmul.f32 %v911_v31, %v1280_v19  ;;  %vm654_vm1 = vweird.f32 %v911_v31 }
 0x3d5   :  { %vm655_vm4 = vmor %vm653_vm3, %vm654_vm1 }
 0x3d6   :  { %v649_v54 = vmul.f32 %v911_v31, %v648_v47  ;;  %v693_v47 = vadd.f32 %v692_v33, %v689_v12 }
 0x3d8   :  { %v650_v61 = vmul.f32 0.5, %v649_v54  ;;  %v744_v54 = vadd.f32 %v743_v39, %v740_v23 }
 0x3da   :  { %v651_v3 = vsub.f32 1.5, %v650_v61 }
 0x3dc   :  { %v652_v9 = vmul.f32 %v911_v31, %v651_v3 }
 0x3de   :  { %v656_v22 = vsel %vm655_vm4, %v911_v31, %v652_v9  ;;  %v726_v31 = vmul.f32 %v725_v52, %v525_v20 }
 0x3df   :  { %v661_v19 = vperm.slane %v656_v22, %v1149_v17  ;;  %v760_v17 = vmul.f32 %v759_v56, %v525_v20  ;;  %v791_v56 = vadd.f32 %v790_v10, %v787_v16 }
 0x3e0   :  { %v727_v53 = vadd.f32 %v726_v31, %v723_v29 }
 0x3e1   :  { %v663_v18 = vmul.f32 %v661_v19, %v1226_v41  ;;  %v761_v57 = vadd.f32 %v760_v17, %v757_v24  ;;  %v795_v0 = vadd.f32 %v794_v14, %v791_v56 }
 0x3e3   :  { %vm664_vm5 = vcmp.gt.f32.partialorder %v663_v18, 0.0  ;;  %v665_v40 = vmul.f32 %v663_v18, %v1291_v21 }
 0x3e5   :  { %v666_v48 = vsel %vm664_vm5, %v663_v18, %v665_v40 }
 0x3e6   :  { %v680_v49 = vmul.f32 %v679_v28, %v666_v48  ;;  %v696_v50 = vmul.f32 %v695_v27, %v666_v48  ;;  %v713_v41 = vmul.f32 %v712_v30, %v666_v48  ;;  %v730_v51 = vmul.f32 %v729_v35, %v666_v48 }
 0x3e7   :  { %v747_v46 = vmul.f32 %v746_v36, %v666_v48  ;;  %v764_v52 = vmul.f32 %v763_v37, %v666_v48  ;;  %v781_v21 = vmul.f32 %v780_v38, %v666_v48  ;;  %v798_v61 = vmul.f32 %v797_v43, %v666_v48 }
 0x3e8   :  { %v681_v55 = vadd.f32 %v680_v49, %v677_v45  ;;  %v697_v59 = vadd.f32 %v696_v50, %v693_v47  ;;  %v714_v60 = vadd.f32 %v713_v41, %v710_v25  ;;  %v731_v58 = vadd.f32 %v730_v51, %v727_v53 }
 0x3e9   :  { %v748_v63 = vadd.f32 %v747_v46, %v744_v54  ;;  %v765_v1 = vadd.f32 %v764_v52, %v761_v57  ;;  %v782_v13 = vadd.f32 %v781_v21, %v778_v62  ;;  %v799_v2 = vadd.f32 %v798_v61, %v795_v0 }
 0x3ea   :  { %682 = vst [vmem:[#allocation12] sm:$0xf] %v681_v55 }
 0x3eb   :  { %699 = vst [vmem:[#allocation12 + $0x4] sm:$0xf] %v697_v59 }
 0x3ec   :  { %716 = vst [vmem:[#allocation12 + $0x8] sm:$0xf] %v714_v60 }
 0x3ed   :  { %733 = vst [vmem:[#allocation12 + $0xc] sm:$0xf] %v731_v58 }
 0x3ee   :  { %750 = vst [vmem:[#allocation12 + $0x10] sm:$0xf] %v748_v63 }
 0x3ef   :  { %767 = vst [vmem:[#allocation12 + $0x14] sm:$0xf] %v765_v1 }
 0x3f0   :  { %784 = vst [vmem:[#allocation12 + $0x18] sm:$0xf] %v782_v13 }
 0x3f1   :  { %801 = vst [vmem:[#allocation12 + $0x1c] sm:$0xf] %v799_v2 }
 0x3f2   :  { %814 = dma.vmem_to_hbm [thread:$0]  %s807_s25, 512, %s809_s29, [#allocation5], %s1030_s30, %s1030_s30, %s1031_s0  }
 0x3f3   :  { %1016 = dma.done.wait [#allocation5], 512  }
 0x3f4   :  { %1017 = vsyncadd [#allocation5], 4294966784 }
 0x3f5   :  { %819 = vsyncpa [#allocation4], 1 }
 0x3f6   :  { %820 = vsyncpa [#allocation11], 1 }
 0x3f7   :  { %821 = vsyncpa [#allocation5], 1 }
 0x3f8   :  { %822 = vsyncpa [#allocation6], 1 }
 0x3f9   :  { %823 = vsyncpa [#allocation9], 1 }

</bundles_post_ra>
